<compile_context>
chip_gen: v5e
topology: v5e:2x2
jax: 0.10.0
libtpu: 0.0.40
codegen_flags: <defaults>
</compile_context>

<pallas_src>
import math
from functools import partial

import jax
import jax.numpy as jnp
from jax.experimental import pallas as pl
from jax.experimental.pallas import tpu as pltpu


def _round_up(x, m):
    return (x + m - 1) // m * m


def _aspp_kernel(x_ref, w_ref, sb_ref, o_ref, acc_ref, *, K, dilation, H, Wk, n_ci):
    # x_ref:   (Hp, Wk, TCin)    bf16 -- one batch elem, one folded-channel tile
    #                            (kw shifts already folded into the channel axis)
    # w_ref:   (K, TCin, TCout)  bf16 -- K = kernel-height taps for this tile
    # sb_ref:  (2, TCout)        f32  -- row 0: BN scale, row 1: BN bias
    # o_ref:   (H, Wk, TCout)
    # acc_ref: (H*Wk, TCout)     f32 VMEM accumulator (resident across ci steps)
    TCin = x_ref.shape[-1]
    TCout = o_ref.shape[-1]
    ci = pl.program_id(2)

    # K kernel-height taps.  The kh*dilation offset is on the leading (untiled)
    # axis -> free slice; Wk % 8 == 0 makes the (H, Wk, C) -> (H*Wk, C) collapse
    # layout-preserving, so each tap feeds the MXU directly with no VMEM
    # relayout copy.
    part = None
    for kh in range(K):
        h0 = kh * dilation
        patch = x_ref[h0:h0 + H, :, :].reshape(H * Wk, TCin)
        contrib = jnp.dot(patch, w_ref[kh], preferred_element_type=jnp.float32)
        part = contrib if part is None else part + contrib

    def finalize(acc):
        # Fused inference BatchNorm + ReLU on the live f32 accumulator value.
        y = acc * sb_ref[0:1, :] + sb_ref[1:2, :]
        o_ref[...] = jnp.maximum(y, 0.0).reshape(H, Wk, TCout).astype(o_ref.dtype)

    if n_ci == 1:
        # Single reduction step: never touch the scratch accumulator.
        finalize(part)
    else:
        @pl.when(ci == 0)
        def _():
            acc_ref[...] = part                      # init from first partial

        @pl.when(jnp.logical_and(ci > 0, ci < n_ci - 1))
        def _():
            acc_ref[...] = acc_ref[...] + part

        @pl.when(ci == n_ci - 1)
        def _():
            finalize(acc_ref[...] + part)            # no store+reload on last step


def aspp_module_forward(x_nchw, weight, bn_gamma, bn_beta, bn_mean, bn_var,
                        dilation, eps=1e-5, out_dtype=None):
    """x_nchw: (N, Cin, H, W); weight: (Cout, Cin, K, K) (PyTorch layout)."""
    N, Cin, H, W = x_nchw.shape
    Cout, _, K, _ = weight.shape
    d = dilation
    pad = 0 if K == 1 else d

    Cin_p = _round_up(Cin, 128)
    Cout_p = _round_up(Cout, 128)
    Wk = _round_up(W, 8)          # kernel-visible / output width (mult of 8)
    Hp = H + 2 * pad
    Cfold = K * Cin_p             # kw taps folded into the reduction axis

    # --- generation-aware tiling / VMEM budget -------------------------------
    try:
        vmem_bytes = int(pltpu.get_tpu_info().vmem_capacity_bytes)
    except Exception:
        vmem_bytes = 64 * 1024 * 1024           # conservative fallback (v7x-sized)
    big_vmem = vmem_bytes > 96 * 1024 * 1024    # v5e/v6e (128 MiB) vs v7x (64 MiB)
    vmem_limit = min(96 * 2**20, max(32 * 2**20, int(vmem_bytes * 0.6)))

    TCout = 256 if Cout_p % 256 == 0 else 128
    # v7x has 2 TensorCores: make sure there is >=2-way "parallel" grid work.
    # (On v5e/v6e keep TCout maximal so each x slab is DMA'd only once per ci.)
    if (not big_vmem) and N * (Cout_p // TCout) < 2 and Cout_p // 128 >= 2:
        TCout = 128

    # TCin=512 only where 128 MiB VMEM allows it (halves ci steps / acc traffic).
    TCin = 128
    for t in ([512, 256, 128] if big_vmem else [256, 128]):
        if Cfold % t == 0:
            TCin = t
            break

    n_co = Cout_p // TCout
    n_ci = Cfold // TCin

    # --- layout glue (NCHW -> NHWC, padding, kw-shift folding, bf16) ---------
    x_nhwc = jnp.transpose(x_nchw, (0, 2, 3, 1)).astype(jnp.bfloat16)
    Wtot = (K - 1) * d + Wk       # padded width so every kw-shifted view fits
    x_pad = jnp.pad(
        x_nhwc, ((0, 0), (pad, pad), (pad, Wtot - pad - W), (0, Cin_p - Cin)))
    # kw shift moved out of the kernel: K width-shifted views folded into the
    # channel axis -> x_cat: (N, Hp, Wk, K*Cin_p).
    x_cat = jnp.concatenate(
        [x_pad[:, :, j * d: j * d + Wk, :] for j in range(K)], axis=-1)

    w_t = jnp.transpose(weight, (2, 3, 1, 0))                 # (KH, KW, Cin, Cout)
    w_p = jnp.pad(w_t, ((0, 0), (0, 0), (0, Cin_p - Cin), (0, Cout_p - Cout)))
    w_fold = w_p.reshape(K, Cfold, Cout_p).astype(jnp.bfloat16)  # matches x_cat order

    scale = bn_gamma / jnp.sqrt(bn_var + eps)
    bias = bn_beta - bn_mean * scale
    sb = jnp.pad(jnp.stack([scale, bias]).astype(jnp.float32),
                 ((0, 0), (0, Cout_p - Cout)))                # (2, Cout_p)

    kernel = partial(_aspp_kernel, K=K, dilation=d, H=H, Wk=Wk, n_ci=n_ci)

    out_nhwc = pl.pallas_call(
        kernel,
        out_shape=jax.ShapeDtypeStruct((N, H, Wk, Cout_p),
                                       out_dtype if out_dtype is not None
                                       else x_nchw.dtype),
        grid=(N, n_co, n_ci),
        in_specs=[
            pl.BlockSpec((pl.Squeezed(), Hp, Wk, TCin),
                         lambda n, co, ci: (n, 0, 0, ci)),
            pl.BlockSpec((K, TCin, TCout), lambda n, co, ci: (0, ci, co)),
            pl.BlockSpec((2, TCout), lambda n, co, ci: (0, co)),
        ],
        out_specs=pl.BlockSpec((pl.Squeezed(), H, Wk, TCout),
                               lambda n, co, ci: (n, 0, 0, co)),
        scratch_shapes=[pltpu.VMEM((H * Wk, TCout), jnp.float32)],
        compiler_params=pltpu.CompilerParams(
            dimension_semantics=("parallel", "parallel", "arbitrary"),
            vmem_limit_bytes=vmem_limit,
        ),
    )(x_cat, w_fold, sb)

    # Drop padded output width/channels, back to NCHW.
    return jnp.transpose(out_nhwc[:, :, :W, :Cout], (0, 3, 1, 2))


def _init_params(key, inplanes, planes, dilation):
    """Deterministic re-implementation of ASPP_module._init_weight()."""
    K = 1 if dilation == 1 else 3
    n = K * K * planes
    std = math.sqrt(2.0 / n)
    weight = jax.random.normal(key, (planes, inplanes, K, K), jnp.float32) * std
    gamma = jnp.ones((planes,), jnp.float32)
    beta = jnp.zeros((planes,), jnp.float32)
    running_mean = jnp.zeros((planes,), jnp.float32)
    running_var = jnp.ones((planes,), jnp.float32)
    return weight, gamma, beta, running_mean, running_var


def _reference_forward(x_nchw, weight, gamma, beta, mean, var, dilation, eps=1e-5):
    """Pure-JAX f32 reference (lax.conv) for correctness checking."""
    K = weight.shape[2]
    pad = 0 if K == 1 else dilation
    y = jax.lax.conv_general_dilated(
        x_nchw, weight,
        window_strides=(1, 1),
        padding=((pad, pad), (pad, pad)),
        rhs_dilation=(dilation, dilation),
        dimension_numbers=("NCHW", "OIHW", "NCHW"),
    )
    s = (gamma / jnp.sqrt(var + eps)).reshape(1, -1, 1, 1)
    b = (beta - mean * gamma / jnp.sqrt(var + eps)).reshape(1, -1, 1, 1)
    return jnp.maximum(y * s + b, 0.0)


if __name__ == "__main__":
    key = jax.random.PRNGKey(0)
    k_w, k_x = jax.random.split(key)

    N, Cin, H, W = 2, 4, 16, 16
    Cout = 8

    x = jax.random.normal(k_x, (N, Cin, H, W), jnp.float32)

    # dilation=2 -> 3x3 atrous conv path (multi-step channel reduction).
    dilation = 2
    weight, gamma, beta, mean, var = _init_params(k_w, Cin, Cout, dilation)
    out = aspp_module_forward(x, weight, gamma, beta, mean, var, dilation)
    out = jax.block_until_ready(out)
    ref = _reference_forward(x, weight, gamma, beta, mean, var, dilation)
    assert out.shape == (N, Cout, H, W)
    # bf16 MXU operands with f32 accumulation vs f32 reference.
    assert jnp.allclose(out, ref, rtol=5e-2, atol=5e-2), "mismatch (dilation=2)"

    # dilation=1 -> 1x1 conv path (single reduction step, no scratch round-trip).
    weight1, gamma1, beta1, mean1, var1 = _init_params(k_w, Cin, Cout, 1)
    out1 = aspp_module_forward(x, weight1, gamma1, beta1, mean1, var1, 1)
    out1 = jax.block_until_ready(out1)
    ref1 = _reference_forward(x, weight1, gamma1, beta1, mean1, var1, 1)
    assert out1.shape == (N, Cout, H, W)
    assert jnp.allclose(out1, ref1, rtol=5e-2, atol=5e-2), "mismatch (dilation=1)"

    print("KERNEL_OK")
</pallas_src>

<mosaic_0001>
module attributes {stable_mosaic.version = 11 : i64} {
  func.func @_aspp_kernel(%arg0: i32, %arg1: i32, %arg2: i32, %arg3: memref<1x20x16x128xbf16, #tpu.memory_space<vmem>>, %arg4: memref<3x128x128xbf16, #tpu.memory_space<vmem>>, %arg5: memref<2x128xf32, #tpu.memory_space<vmem>>, %arg6: memref<1x16x16x128xf32, #tpu.memory_space<vmem>>, %arg7: memref<256x128xf32, #tpu.memory_space<vmem>>) attributes {dimension_semantics = [#tpu.dimension_semantics<parallel>, #tpu.dimension_semantics<parallel>, #tpu.dimension_semantics<arbitrary>], iteration_bounds = array<i64: 2, 1, 3>, scalar_prefetch = 0 : i64, scratch_operands = 1 : i64, tpu.core_type = #tpu.core_type<tc>, window_params = [{transform_indices = @transform_0, window_bounds = array<i64: 1, 20, 16, 128>}, {transform_indices = @transform_1, window_bounds = array<i64: 3, 128, 128>}, {transform_indices = @transform_2, window_bounds = array<i64: 2, 128>}, {transform_indices = @transform_3, window_bounds = array<i64: 1, 16, 16, 128>}]} {
    %c0 = arith.constant 0 : index
    %c0_0 = arith.constant 0 : index
    %c0_1 = arith.constant 0 : index
    %c0_2 = arith.constant 0 : index
    %0 = vector.load %arg3[%c0, %c0_0, %c0_1, %c0_2] : memref<1x20x16x128xbf16, #tpu.memory_space<vmem>>, vector<1x16x16x128xbf16>
    %1 = vector.shape_cast %0 : vector<1x16x16x128xbf16> to vector<16x16x128xbf16>
    %2 = vector.shape_cast %1 : vector<16x16x128xbf16> to vector<256x128xbf16>
    %c0_3 = arith.constant 0 : index
    %c0_4 = arith.constant 0 : index
    %c0_5 = arith.constant 0 : index
    %3 = vector.load %arg4[%c0_3, %c0_4, %c0_5] : memref<3x128x128xbf16, #tpu.memory_space<vmem>>, vector<1x128x128xbf16>
    %4 = vector.shape_cast %3 : vector<1x128x128xbf16> to vector<128x128xbf16>
    %cst = arith.constant dense<0.000000e+00> : vector<256x128xf32>
    %5 = tpu.matmul %2, %4, %cst {dimension_numbers = #tpu.dot_dimension_numbers<[1], [0], [0], [1], [0, 0, 1, 1], [], []>} : vector<256x128xbf16>, vector<128x128xbf16>, vector<256x128xf32> -> vector<256x128xf32>
    %c0_6 = arith.constant 0 : index
    %c2 = arith.constant 2 : index
    %c0_7 = arith.constant 0 : index
    %c0_8 = arith.constant 0 : index
    %6 = vector.load %arg3[%c0_6, %c2, %c0_7, %c0_8] : memref<1x20x16x128xbf16, #tpu.memory_space<vmem>>, vector<1x16x16x128xbf16>
    %7 = vector.shape_cast %6 : vector<1x16x16x128xbf16> to vector<16x16x128xbf16>
    %8 = vector.shape_cast %7 : vector<16x16x128xbf16> to vector<256x128xbf16>
    %c1 = arith.constant 1 : index
    %c0_9 = arith.constant 0 : index
    %c0_10 = arith.constant 0 : index
    %9 = vector.load %arg4[%c1, %c0_9, %c0_10] : memref<3x128x128xbf16, #tpu.memory_space<vmem>>, vector<1x128x128xbf16>
    %10 = vector.shape_cast %9 : vector<1x128x128xbf16> to vector<128x128xbf16>
    %cst_11 = arith.constant dense<0.000000e+00> : vector<256x128xf32>
    %11 = tpu.matmul %8, %10, %cst_11 {dimension_numbers = #tpu.dot_dimension_numbers<[1], [0], [0], [1], [0, 0, 1, 1], [], []>} : vector<256x128xbf16>, vector<128x128xbf16>, vector<256x128xf32> -> vector<256x128xf32>
    %12 = arith.addf %5, %11 : vector<256x128xf32>
    %c0_12 = arith.constant 0 : index
    %c4 = arith.constant 4 : index
    %c0_13 = arith.constant 0 : index
    %c0_14 = arith.constant 0 : index
    %13 = vector.load %arg3[%c0_12, %c4, %c0_13, %c0_14] : memref<1x20x16x128xbf16, #tpu.memory_space<vmem>>, vector<1x16x16x128xbf16>
    %14 = vector.shape_cast %13 : vector<1x16x16x128xbf16> to vector<16x16x128xbf16>
    %15 = vector.shape_cast %14 : vector<16x16x128xbf16> to vector<256x128xbf16>
    %c2_15 = arith.constant 2 : index
    %c0_16 = arith.constant 0 : index
    %c0_17 = arith.constant 0 : index
    %16 = vector.load %arg4[%c2_15, %c0_16, %c0_17] : memref<3x128x128xbf16, #tpu.memory_space<vmem>>, vector<1x128x128xbf16>
    %17 = vector.shape_cast %16 : vector<1x128x128xbf16> to vector<128x128xbf16>
    %cst_18 = arith.constant dense<0.000000e+00> : vector<256x128xf32>
    %18 = tpu.matmul %15, %17, %cst_18 {dimension_numbers = #tpu.dot_dimension_numbers<[1], [0], [0], [1], [0, 0, 1, 1], [], []>} : vector<256x128xbf16>, vector<128x128xbf16>, vector<256x128xf32> -> vector<256x128xf32>
    %19 = arith.addf %12, %18 : vector<256x128xf32>
    %c0_i32 = arith.constant 0 : i32
    %20 = arith.cmpi eq, %arg2, %c0_i32 : i32
    %21 = arith.extui %20 : i1 to i32
    %c0_i32_19 = arith.constant 0 : i32
    %22 = arith.cmpi ne, %21, %c0_i32_19 : i32
    scf.if %22 {
      %c0_24 = arith.constant 0 : index
      %c0_25 = arith.constant 0 : index
      %31 = vector.load %arg7[%c0_24, %c0_25] : memref<256x128xf32, #tpu.memory_space<vmem>>, vector<256x128xf32>
      tpu.vector_store %arg7[%c0_24, %c0_25], %19 {strides = array<i32>} : memref<256x128xf32, #tpu.memory_space<vmem>>, vector<256x128xf32>,
    } else {
    }
    %c0_i32_20 = arith.constant 0 : i32
    %23 = arith.cmpi sgt, %arg2, %c0_i32_20 : i32
    %c2_i32 = arith.constant 2 : i32
    %24 = arith.cmpi slt, %arg2, %c2_i32 : i32
    %25 = arith.andi %23, %24 : i1
    %26 = arith.extui %25 : i1 to i32
    %c0_i32_21 = arith.constant 0 : i32
    %27 = arith.cmpi ne, %26, %c0_i32_21 : i32
    scf.if %27 {
      %c0_24 = arith.constant 0 : index
      %c0_25 = arith.constant 0 : index
      %31 = vector.load %arg7[%c0_24, %c0_25] : memref<256x128xf32, #tpu.memory_space<vmem>>, vector<256x128xf32>
      %32 = arith.addf %31, %19 : vector<256x128xf32>
      %c0_26 = arith.constant 0 : index
      %c0_27 = arith.constant 0 : index
      %33 = vector.load %arg7[%c0_26, %c0_27] : memref<256x128xf32, #tpu.memory_space<vmem>>, vector<256x128xf32>
      tpu.vector_store %arg7[%c0_26, %c0_27], %32 {strides = array<i32>} : memref<256x128xf32, #tpu.memory_space<vmem>>, vector<256x128xf32>,
    } else {
    }
    %c2_i32_22 = arith.constant 2 : i32
    %28 = arith.cmpi eq, %arg2, %c2_i32_22 : i32
    %29 = arith.extui %28 : i1 to i32
    %c0_i32_23 = arith.constant 0 : i32
    %30 = arith.cmpi ne, %29, %c0_i32_23 : i32
    scf.if %30 {
      %c0_24 = arith.constant 0 : index
      %c0_25 = arith.constant 0 : index
      %31 = vector.load %arg7[%c0_24, %c0_25] : memref<256x128xf32, #tpu.memory_space<vmem>>, vector<256x128xf32>
      %32 = arith.addf %31, %19 : vector<256x128xf32>
      %c0_26 = arith.constant 0 : index
      %c0_27 = arith.constant 0 : index
      %33 = vector.load %arg5[%c0_26, %c0_27] : memref<2x128xf32, #tpu.memory_space<vmem>>, vector<1x128xf32>
      %34 = vector.broadcast %33 : vector<1x128xf32> to vector<256x128xf32>
      %35 = arith.mulf %32, %34 : vector<256x128xf32>
      %c1_28 = arith.constant 1 : index
      %c0_29 = arith.constant 0 : index
      %36 = vector.load %arg5[%c1_28, %c0_29] : memref<2x128xf32, #tpu.memory_space<vmem>>, vector<1x128xf32>
      %37 = vector.broadcast %36 : vector<1x128xf32> to vector<256x128xf32>
      %38 = arith.addf %35, %37 : vector<256x128xf32>
      %cst_30 = arith.constant 0.000000e+00 : f32
      %39 = vector.broadcast %cst_30 : f32 to vector<256x128xf32>
      %40 = arith.maximumf %38, %39 : vector<256x128xf32>
      %41 = vector.shape_cast %40 : vector<256x128xf32> to vector<16x16x128xf32>
      %c0_31 = arith.constant 0 : index
      %c0_32 = arith.constant 0 : index
      %c0_33 = arith.constant 0 : index
      %c0_34 = arith.constant 0 : index
      %42 = vector.load %arg6[%c0_31, %c0_32, %c0_33, %c0_34] : memref<1x16x16x128xf32, #tpu.memory_space<vmem>>, vector<1x16x16x128xf32>
      %43 = vector.shape_cast %42 : vector<1x16x16x128xf32> to vector<16x16x128xf32>
      %44 = vector.shape_cast %41 : vector<16x16x128xf32> to vector<1x16x16x128xf32>
      tpu.vector_store %arg6[%c0_31, %c0_32, %c0_33, %c0_34], %44 {strides = array<i32>} : memref<1x16x16x128xf32, #tpu.memory_space<vmem>>, vector<1x16x16x128xf32>,
    } else {
    }
    return
  }
  func.func @transform_0(%arg0: i32, %arg1: i32, %arg2: i32) -> (i32, i32, i32, i32) {
    %c0_i32 = arith.constant 0 : i32
    %c0_i32_0 = arith.constant 0 : i32
    %c0_i32_1 = arith.constant 0 : i32
    return %arg0, %c0_i32, %c0_i32_0, %arg2 : i32, i32, i32, i32
  }
  func.func @transform_1(%arg0: i32, %arg1: i32, %arg2: i32) -> (i32, i32, i32) {
    %c0_i32 = arith.constant 0 : i32
    %c0_i32_0 = arith.constant 0 : i32
    return %c0_i32, %arg2, %arg1 : i32, i32, i32
  }
  func.func @transform_2(%arg0: i32, %arg1: i32, %arg2: i32) -> (i32, i32) {
    %c0_i32 = arith.constant 0 : i32
    %c0_i32_0 = arith.constant 0 : i32
    return %c0_i32, %arg1 : i32, i32
  }
  func.func @transform_3(%arg0: i32, %arg1: i32, %arg2: i32) -> (i32, i32, i32, i32) {
    %c0_i32 = arith.constant 0 : i32
    %c0_i32_0 = arith.constant 0 : i32
    %c0_i32_1 = arith.constant 0 : i32
    return %arg0, %c0_i32, %c0_i32_0, %arg1 : i32, i32, i32, i32
  }
}

</mosaic_0001>

<bundles_post_ra>
// kernel: tpu_custom_call.1
= control target key start
LH: loop header
LB: loop body
LE: loop exit
PB: predicated region body
PF: predicated region fallthrough
CT: control target
= control target key end

     0   :  { %s3235_s0 = inlined_call_operand.hbm [shape: bf16[2,20,16,384], index: 0, kind: input, shape index: {}]   ;;  %s3236_s1 = inlined_call_operand.hbm [shape: bf16[3,384,128], index: 1, kind: input, shape index: {}]   ;;  %s3237_s2 = inlined_call_operand.hbm [shape: f32[2,128], index: 2, kind: input, shape index: {}]   ;;  %s3238_s3 = inlined_call_operand.hbm [shape: f32[2,16,16,128], index: 3, kind: output, shape index: {}]  }
   0x1   :  { %3249 = sst [smem:[#allocation28_spill]] %s3237_s2 }
   0x2   :  { %3250 = sst [smem:[#allocation29_spill]] %s3238_s3 }
   0x3   :  { %8 = vsyncpa [#allocation4], 0 }
   0x4   :  { %10 = vsyncpa [#allocation4 + $0x1], 0 }
   0x5   :  { %11 = vsyncpa [#allocation7], 0 }
   0x6   :  { %13 = vsyncpa [#allocation7 + $0x1], 0 }
   0x7   :  { %14 = vsyncpa [#allocation5], 0 }
   0x8   :  { %16 = vsyncpa [#allocation5 + $0x1], 0  ;;  %s2575_s12 = smov 0   ;;  %s2577_s13 = smov 0  }
   0x9   :  { %s2579_s14 = smov 0   ;;  %s2581_s15 = smov 0  }
   0xa   :  { %s2583_s16 = smov 0   ;;  %s2585_s17 = smov 0  }
   0xb   :  { %s2587_s18 = smov 0   ;;  %s2589_s19 = smov 0  }
   0xc   :  { %s2591_s20 = smov 0   ;;  %s2593_s21 = smov 0  }
   0xd   :  { %s2595_s22 = smov 0   ;;  %s2597_s23 = smov 0  }
   0xe   :  { %s2599_s24 = smov 0   ;;  %s2601_s25 = smov 0  }
   0xf LB: > { %3251 = sst [smem:[#allocation17_spill]] %s2489_s12  ;;  %s2644_s26 = sadd.s32 4294967295, %s2541_s25   ;;  %s2541_s25 = sphi %s2601_s25, %s22_s25   ;;  %s2537_s24 = sphi %s2599_s24, %s3302_s24   ;;  %s2533_s23 = sphi %s2597_s23, %s3301_s23   ;;  %s2529_s22 = sphi %s2595_s22, %s3300_s22   ;;  %s2525_s21 = sphi %s2593_s21, %s3299_s21   ;;  %s2521_s20 = sphi %s2591_s20, %s3298_s20   ;;  %s2517_s19 = sphi %s2589_s19, %s3297_s19   ;;  %s2513_s18 = sphi %s2587_s18, %s3296_s18   ;;  %s2509_s17 = sphi %s2585_s17, %s3295_s17   ;;  %s2505_s16 = sphi %s2583_s16, %s3294_s16   ;;  %s2501_s15 = sphi %s2581_s15, %s3293_s15   ;;  %s2497_s14 = sphi %s2579_s14, %s3292_s14   ;;  %s2493_s13 = sphi %s2577_s13, %s3291_s13   ;;  %s2489_s12 = sphi %s2575_s12, %s3290_s12  }
  0x10   : > { %3252 = sst [smem:[#allocation18_spill]] %s2497_s14  ;;  %s34_s28 = sadd.s32 1, %s2533_s23 }
  0x11   : > { %3253 = sst [smem:[#allocation19_spill]] %s2525_s21  ;;  %s41_s29 = sadd.s32 1, %s2537_s24 }
  0x12   : > { %3254 = sst [smem:[#allocation20_spill]] %s2529_s22  ;;  %p35_p0 = scmp.ge.s32.totalorder %s34_s28, 3 }
  0x13   : > { %s50_s30 = sadd.s32 1, %s2521_s20  ;;  %p57_p1 = scmp.ne.s32.totalorder %s2521_s20, %s2517_s19 }
  0x14   : > { %p58_p2 = scmp.eq.s32.totalorder %s2541_s25, 0  ;;  %s3304_s28 = smov (%p35_p0, %s34_s28), 0 }
  0x15   : > { %3255 = sst [smem:[#allocation21_spill]] %s3304_s28  ;;  %s3306_s29 = smov (!%p35_p0, %s41_s29), %s2537_s24 }
  0x16   : > { %s46_s4 = ssub.s32 %s2533_s23, %s3304_s28  ;;  %p2660_p3 = por %p58_p2, %p57_p1 }
  0x17   : > { %p43_p4 = scmp.ge.s32.totalorder %s3306_s29, 2  ;;  %p63_p5 = scmp.ne.s32.totalorder %s2517_s19, %s2513_s18 }
  0x18   : > { %p3240_p6 = scmp.eq.s32.totalorder %s2644_s26, 0  ;;  %p76_p7 = scmp.eq.s32.totalorder %s46_s4, 0 }
  0x19   : > { %s3308_s29 = smov (%p43_p4, %s3306_s29), 0  ;;  %s78_s7 = sadd.s32 1, %s2509_s17 }
  0x1a   : > { %3257 = sst [smem:[#allocation22_spill]] %s3308_s29  ;;  %p2670_p8 = por %p3240_p6, %p63_p5 }
  0x1b   : > { %s45_s8 = ssub.s32 %s2537_s24, %s3308_s29  ;;  %p85_p9 = scmp.ne.s32.totalorder %s2509_s17, %s2505_s16 }
  0x1c   : > { %s47_s9 = sor.u32 %s46_s4, %s45_s8  ;;  %p91_p10 = scmp.ne.s32.totalorder %s2505_s16, %s2501_s15 }
  0x1d   : > { %p48_p11 = scmp.eq.s32.totalorder %s47_s9, 0  ;;  %p2683_p12 = por %p85_p9, %p58_p2 }
  0x1e   : > { %s2688_s11 = scalar_select %p76_p7, %s2509_s17, %s78_s7  }
  0x1f   : > { %s2691_s18 = scalar_select %p48_p11, %s2521_s20, %s50_s30  }
  0x20   : > { %3260 = sst [smem:[#allocation23_spill]] %s2688_s11  ;;  %p2695_p13 = por %p91_p10, %p3240_p6 }
  0x21   : > { %3261 = sst [smem:[#allocation24_spill]] %s2691_s18  ;;  %p130_p0 = scmp.eq.s32.totalorder %s45_s8, 0 }
  0x22   : > { %s132_s29 = sadd.s32 1, %s2497_s14  ;;  %p142_p1 = scmp.ne.s32.totalorder %s2497_s14, %s2493_s13 }
  0x23   : > { %s2703_s15 = scalar_select %p130_p0, %s2497_s14, %s132_s29  }
  0x24   : > { %p143_p4 = scmp.eq.s32.totalorder %s2644_s26, 5  ;;  %p148_p2 = scmp.ne.s32.totalorder %s2493_s13, %s2489_s12 }
  0x25   : > { %3263 = sst [smem:[#allocation25_spill]] %s2703_s15  ;;  %s3264_s4 = sadd.s32 4294967294, %s2541_s25  }
  0x26   : > { %p149_p5 = scmp.eq.s32.totalorder %s3264_s4, 5  ;;  %p1670_p9 = scmp.ge.s32.totalorder %s2541_s25, 1 }
  0x27   : > { %p2711_p7 = por %p143_p4, %p142_p1  ;;  %p156_p11 = scmp.lt.s32.totalorder %s2541_s25, 7 }
  0x28   : > { %p2716_p10 = por %p149_p5, %p148_p2  ;;  %s3270_s2 = sld [smem:[#allocation28_spill]] }
  0x29   : > { %s3265_s7 = scalar_select %p2711_p7, 1, 0 }
  0x2a   : > { %s3267_s30 = scalar_select %p2716_p10, 1, 0 }
  0x2b   : > { %3266 = sst [smem:[#allocation26_spill]] %s3265_s7  ;;  %p2720_p6 = pnand %p1670_p9, %p156_p11 }
  0x2c   : > { %3268 = sst [smem:[#allocation27_spill]] %s3267_s30  ;;  %s2543_s4 = smov [#allocation8]  }
  0x2d   : > { %p2192_p0 = pneg %p2720_p6  ;;  %s172_s18 = sshll.u32 %s2543_s4, 4  ;;  %s173_s18 = int_to_ptr.vmem [resolvable:$true] %s172_s18 }
  0x2e   : > { %s170_s28 = sshll.u32 %s3270_s2, 4  ;;  %p3271_p1 = scmp.eq.s32.totalorder %s2644_s26, 0  ;;  %s171_s28 = int_to_ptr.hbm [resolvable:$true] %s170_s28 }
  0x2f   : > { %p1672_p2 = scmp.ge.s32.totalorder %s2541_s25, 6 }
  0x30   : > { %p2193_p4 = pnand %p2192_p0, %p3271_p1  ;;  %s183_s11 = sand.u32 (!%p1672_p2), 1, %s2521_s20  }
  0x31   : > { %179 = sbr.rel (%p1672_p2) target bundleno = 72 (0x48), region = 20  ;;  %s2545_s22 = smov (!%p1672_p2), 64  }
  0x32   : > { %2195 = dma.hbm_to_vmem [thread:$0]  (!%p2193_p4), %s171_s28, 32, %s173_s18, [#allocation7]  }
  0x33   : > { %s2171_s29 = smul.u32 (!%p1672_p2), 120, %s2537_s24  ;;  %s184_s28 = scalar_lea.sflag (!%p1672_p2), [#allocation4], %s183_s11 }
  0x34   : > { %s2170_s9 = smul.u32 (!%p1672_p2), 160, %s183_s11  ;;  %s2544_s18 = smov (!%p1672_p2), 192  }
  0x35   : > { %s191_s2 = sadd.s32 (!%p1672_p2), %s2533_s23, %s2171_s29  ;;  %s2546_s21 = smov (!%p1672_p2), 4  }
  0x36   : > { %s1673_s15 = sshll.u32 %s191_s2, 2  ;;  %s187_s12 = scalar_lea.vmem [#allocation3], %s2170_s9 }
  0x37   : > { %s193_s4 = scalar_lea.hbm %s3235_s0, %s1673_s15  ;;  %s196_s3 = sshll.u32 %s187_s12, 4  ;;  %s197_s3 = int_to_ptr.vmem [resolvable:$true] %s196_s3 }
  0x38   : > { %s194_s7 = sshll.u32 %s193_s4, 4  ;;  %s195_s7 = int_to_ptr.hbm [resolvable:$true] %s194_s7 }
  0x39   : > { %2177 = dma.hbm_to_vmem [thread:$0]  (%p2660_p3), %s195_s7, 2560, %s197_s3, %s184_s28, %s2544_s18, %s2545_s22, %s2546_s21  }
  0x3a   : > { %s206_s2 = sand.u32 1, %s2541_s25   ;;  %s208_s14 = sand.u32 1, %s2509_s17  }
  0x3b   : > { %s2172_s15 = smul.u32 192, %s208_s14  ;;  %s2072_s12 = sshll.u32 %s2533_s23, 6 }
  0x3c   : > { %s216_s11 = scalar_lea.hbm %s3236_s1, %s2072_s12  ;;  %s2547_s7 = smov 3072  }
  0x3d   : > { %s2178_s9 = scalar_select %p2683_p12, [#allocation0], [#allocation12] }
  0x3e   : > { %s229_s3 = sshll.u32 %s216_s11, 4  ;;  %s210_s21 = scalar_lea.vmem [#allocation6], %s2172_s15  ;;  %s230_s3 = int_to_ptr.hbm [resolvable:$true] %s229_s3 }
  0x3f   : > { %s231_s22 = sshll.u32 %s210_s21, 4  ;;  %s221_s5 = sld [smem:[%s2178_s9]]   ;;  %s232_s22 = int_to_ptr.vmem [resolvable:$true] %s231_s22 }
  0x40   : > { %2179 = sst [smem:[#allocation11]] (%p2683_p12), %s2547_s7  ;;  %s2548_s4 = smov 1024  }
  0x41   : > { %2180 = sst [smem:[#allocation11 + $0x1]] (%p2683_p12), %s2548_s4  ;;  %s2549_s28 = smov 16  }
  0x42   : > { %2181 = sst [smem:[#allocation11 + $0x2]] (%p2683_p12), %s2549_s28  ;;  %s2550_s18 = smov 64  }
  0x43   : > { %2182 = sst [smem:[#allocation11 + $0x3]] (%p2683_p12), %s2550_s18  ;;  %s2551_s12 = smov 4  }
  0x44   : > { %2183 = sst [smem:[#allocation11 + $0x4]] (%p2683_p12), %s2550_s18  ;;  %s207_s30 = scalar_lea.sflag [#allocation7], %s206_s2 }
  0x45   : > { %s1676_s14 = sshll.u32 %s221_s5, 26  ;;  %2184 = sst [smem:[#allocation11 + $0x5]] (%p2683_p12), %s2551_s12 }
  0x46   : > { %s1677_s15 = sadd.s32 134217728, %s1676_s14  ;;  %s2552_s29 = smov [#allocation10]  }
  0x47   : > { %2185 = dma.general (%p2683_p12), %s230_s3, 3072, %s232_s22, %s207_s30, %s2552_s29, [#allocation11], %s1677_s15, 0  }
  0x48 PF: > { %256 = sbr.rel (%p2720_p6) target bundleno = 595 (0x253), region = 32  ;;  %s258_s11 = sand.u32 (!%p2720_p6), 1, %s2517_s19  }
  0x49   : > { %s2173_s9 = smul.u32 (!%p2720_p6), 160, %s258_s11  ;;  %s259_s21 = scalar_lea.sflag (!%p2720_p6), [#allocation4], %s258_s11 }
  0x4b   : > { %s2765_s5 = scalar_lea.vmem (!%p2720_p6), [#allocation3], %s2173_s9 }
  0x4d   : > { %2472 = dma.done.wait (%p2670_p8), %s259_s21, 2560  }
  0x4e   : > { %2474 = vsyncadd (%p2670_p8), %s259_s21, 4294964736  ;;  %s268_s10 = sand.u32 1, %s2644_s26   ;;  %s270_s2 = sand.u32 1, %s2505_s16  }
  0x4f   : > { %s2174_s3 = smul.u32 192, %s270_s2  ;;  %s269_s8 = scalar_lea.sflag [#allocation7], %s268_s10 }
  0x51   : > { %s2773_s22 = scalar_lea.vmem [#allocation6], %s2174_s3 }
  0x52   : > { %2476 = dma.done.wait (%p2695_p13), %s269_s8, 3072  }
  0x53   : > { %2478 = vsyncadd (%p2695_p13), %s269_s8, 4294964224  ;;  %p3272_p3 = scmp.eq.s32.totalorder %s2644_s26, 0 }
  0x55   : > { %2480 = dma.done.wait (%p3272_p3), [#allocation7], 32   ;;  %p3273_p6 = pmov %p3272_p3 }
  0x56   : > { %s303_s6 = sand.u32 1, %s2493_s13   ;;  %v2120_v0 = vld [vmem:[%s2773_s22 + $0x78] sm:$0xff]  ;;  %v2119_v3 = vld [vmem:[%s2773_s22 + $0x70] sm:$0xff]  ;;  %v2118_v6 = vld [vmem:[%s2773_s22 + $0x68] sm:$0xff]  ;;  %s3274_s27 = sld [smem:[#allocation19_spill]] }
  0x57   : > { %2482 = vsyncadd (%p3273_p6), [#allocation7], 4294967264  ;;  %s2786_s7 = sshll.u32 %s303_s6, 8  ;;  %v2096_v1 = vld [vmem:[%s2773_s22 + $0x38] sm:$0xff]  ;;  %549 = vmatpush.bf16.msra.mxu0 %v2120_v0  ;;  %2146 = vmatpush.bf16.msra.mxu3 %v2120_v0  ;;  %v2095_v4 = vld [vmem:[%s2773_s22 + $0x30] sm:$0xff] }
  0x58   : > { %v2791_v2 = vld [vmem:[%s2773_s22 + $0xb8] sm:$0xff]  ;;  %782 = vmatpush.bf16.msra.mxu1 %v2096_v1  ;;  %v2797_v5 = vld [vmem:[%s2773_s22 + $0xb0] sm:$0xff]  ;;  %v2094_v7 = vld [vmem:[%s2773_s22 + $0x28] sm:$0xff]  ;;  %s2964_s26 = scalar_lea.vmem [#allocation9], %s2786_s7 }
  0x59   : > { %1065 = vmatpush.bf16.msra.mxu2 %v2791_v2  ;;  %v2803_v8 = vld [vmem:[%s2773_s22 + $0xa8] sm:$0xff]  ;;  %v2117_v9 = vld [vmem:[%s2773_s22 + $0x60] sm:$0xff]  ;;  %v2116_v12 = vld [vmem:[%s2773_s22 + $0x58] sm:$0xff] }
  0x5a   : > { %v2093_v10 = vld [vmem:[%s2773_s22 + $0x20] sm:$0xff]  ;;  %v2092_v13 = vld [vmem:[%s2773_s22 + $0x18] sm:$0xff]  ;;  %v2115_v15 = vld [vmem:[%s2773_s22 + $0x50] sm:$0xff] }
  0x5b   : > { %550 = vmatpush.bf16.msra.mxu0 %v2119_v3  ;;  %2147 = vmatpush.bf16.msra.mxu3 %v2119_v3  ;;  %v2809_v11 = vld [vmem:[%s2773_s22 + $0xa0] sm:$0xff]  ;;  %v2815_v14 = vld [vmem:[%s2773_s22 + $0x98] sm:$0xff]  ;;  %v2091_v16 = vld [vmem:[%s2773_s22 + $0x10] sm:$0xff] }
  0x5c   : > { %783 = vmatpush.bf16.msra.mxu1 %v2095_v4  ;;  %v2821_v17 = vld [vmem:[%s2773_s22 + $0x90] sm:$0xff]  ;;  %v2114_v18 = vld [vmem:[%s2773_s22 + $0x48] sm:$0xff]  ;;  %v2113_v21 = vld [vmem:[%s2773_s22 + $0x40] sm:$0xff]  ;;  %p2065_p8 = scmp.ne.s32.totalorder %s3274_s27, 0 }
  0x5d   : > { %1066 = vmatpush.bf16.msra.mxu2 %v2797_v5  ;;  %v2090_v19 = vld [vmem:[%s2773_s22 + $0x8] sm:$0xff]  ;;  %v2089_v22 = vld [vmem:[%s2773_s22] sm:$0xff]  ;;  %v2097_v24 = vld [vmem:[%s2765_s5 + $0x10] sm:$0xff] }
  0x5e   : > { %v2138_v20 = vld [vmem:[%s2773_s22 + $0x88] sm:$0xff]  ;;  %v2137_v23 = vld [vmem:[%s2773_s22 + $0x80] sm:$0xff]  ;;  %v2109_v25 = vld [vmem:[%s2765_s5 + $0x70] sm:$0xff] }
  0x5f   : > { %551 = vmatpush.bf16.msra.mxu0 %v2118_v6  ;;  %2148 = vmatpush.bf16.msra.mxu3 %v2118_v6  ;;  %v2073_v26 = vld [vmem:[%s2765_s5] sm:$0xff]  ;;  %v2098_v28 = vld [vmem:[%s2765_s5 + $0x18] sm:$0xff]  ;;  %v2074_v30 = vld [vmem:[%s2765_s5 + $0x8] sm:$0xff] }
  0x60   : > { %784 = vmatpush.bf16.msra.mxu1 %v2094_v7  ;;  %v2121_v27 = vld [vmem:[%s2765_s5 + $0x20] sm:$0xff]  ;;  %v2110_v29 = vld [vmem:[%s2765_s5 + $0x78] sm:$0xff]  ;;  %v2122_v31 = vld [vmem:[%s2765_s5 + $0x28] sm:$0xff] }
  0x61   : > { %1067 = vmatpush.bf16.msra.mxu2 %v2803_v8  ;;  %v2099_v32 = vld [vmem:[%s2765_s5 + $0x20] sm:$0xff]  ;;  %v2075_v34 = vld [vmem:[%s2765_s5 + $0x10] sm:$0xff]  ;;  %v2100_v36 = vld [vmem:[%s2765_s5 + $0x28] sm:$0xff] }
  0x62   : > { %v2111_v33 = vld [vmem:[%s2765_s5 + $0x80] sm:$0xff]  ;;  %v2123_v35 = vld [vmem:[%s2765_s5 + $0x30] sm:$0xff]  ;;  %v2112_v37 = vld [vmem:[%s2765_s5 + $0x88] sm:$0xff] }
  0x63   : > { %552 = vmatpush.bf16.msra.mxu0 %v2117_v9  ;;  %2149 = vmatpush.bf16.msra.mxu3 %v2117_v9  ;;  %v2076_v38 = vld [vmem:[%s2765_s5 + $0x18] sm:$0xff]  ;;  %v2101_v40 = vld [vmem:[%s2765_s5 + $0x30] sm:$0xff]  ;;  %v2085_v41 = vld [vmem:[%s2765_s5 + $0x60] sm:$0xff] }
  0x64   : > { %785 = vmatpush.bf16.msra.mxu1 %v2093_v10  ;;  %v2124_v39 = vld [vmem:[%s2765_s5 + $0x38] sm:$0xff]  ;;  %v2077_v42 = vld [vmem:[%s2765_s5 + $0x20] sm:$0xff]  ;;  %v2086_v45 = vld [vmem:[%s2765_s5 + $0x68] sm:$0xff] }
  0x65   : > { %1068 = vmatpush.bf16.msra.mxu2 %v2809_v11  ;;  %v2125_v43 = vld [vmem:[%s2765_s5 + $0x40] sm:$0xff]  ;;  %v2102_v44 = vld [vmem:[%s2765_s5 + $0x38] sm:$0xff]  ;;  %v2078_v46 = vld [vmem:[%s2765_s5 + $0x28] sm:$0xff] }
  0x66   : > { %v2126_v47 = vld [vmem:[%s2765_s5 + $0x48] sm:$0xff]  ;;  %v2103_v48 = vld [vmem:[%s2765_s5 + $0x40] sm:$0xff]  ;;  %v2087_v49 = vld [vmem:[%s2765_s5 + $0x70] sm:$0xff] }
  0x67   : > { %553 = vmatpush.bf16.msra.mxu0 %v2116_v12  ;;  %2150 = vmatpush.bf16.msra.mxu3 %v2116_v12  ;;  %v2079_v50 = vld [vmem:[%s2765_s5 + $0x30] sm:$0xff]  ;;  %v2104_v52 = vld [vmem:[%s2765_s5 + $0x48] sm:$0xff]  ;;  %v2088_v53 = vld [vmem:[%s2765_s5 + $0x78] sm:$0xff] }
  0x68   : > { %786 = vmatpush.bf16.msra.mxu1 %v2092_v13  ;;  %v2127_v51 = vld [vmem:[%s2765_s5 + $0x50] sm:$0xff]  ;;  %v2080_v54 = vld [vmem:[%s2765_s5 + $0x38] sm:$0xff]  ;;  %v2133_v57 = vld [vmem:[%s2765_s5 + $0x80] sm:$0xff] }
  0x69   : > { %1069 = vmatpush.bf16.msra.mxu2 %v2815_v14  ;;  %v2128_v55 = vld [vmem:[%s2765_s5 + $0x58] sm:$0xff]  ;;  %v2105_v56 = vld [vmem:[%s2765_s5 + $0x50] sm:$0xff]  ;;  %v2081_v59 = vld [vmem:[%s2765_s5 + $0x40] sm:$0xff] }
  0x6a   : > { %v2129_v60 = vld [vmem:[%s2765_s5 + $0x60] sm:$0xff]  ;;  %v2130_v12 = vld [vmem:[%s2765_s5 + $0x68] sm:$0xff] }
  0x6b   : > { %554 = vmatpush.bf16.msra.mxu0 %v2115_v15  ;;  %2151 = vmatpush.bf16.msra.mxu3 %v2115_v15 }
  0x6c   : > { %787 = vmatpush.bf16.msra.mxu1 %v2091_v16 }
  0x6d   : > { %1070 = vmatpush.bf16.msra.mxu2 %v2821_v17 }
  0x6f   : > { %555 = vmatpush.bf16.msra.mxu0 %v2114_v18  ;;  %2152 = vmatpush.bf16.msra.mxu3 %v2114_v18 }
  0x70   : > { %788 = vmatpush.bf16.msra.mxu1 %v2090_v19 }
  0x71   : > { %1071 = vmatpush.bf16.msra.mxu2 %v2138_v20 }
  0x73   : > { %556 = vmatpush.bf16.msra.mxu0 %v2113_v21  ;;  %2153 = vmatpush.bf16.msra.mxu3 %v2113_v21 }
  0x74   : > { %789 = vmatpush.bf16.msra.mxu1 %v2089_v22 }
  0x75   : > { %1072 = vmatpush.bf16.msra.mxu2 %v2137_v23 }
  0x76   : > { %557 = vmatmul.bf16.vlgmr.msra.gmra.mxu0 %v2097_v24  ;;  %617 = vmatmul.bf16.vlgmr.msra.gmra.mxu3 %v2109_v25  ;;  %v2135_v24 = vld [vmem:[%s2765_s5 + $0x90] sm:$0xff] }
  0x77   : > { %2154 = vmatpush.bf16.msrb.mxu3 %v2096_v1  ;;  %790 = vmatmul.bf16.vlgmr.msra.gmra.mxu1 %v2073_v26 }
  0x78   : > { %1073 = vmatmul.bf16.vlgmr.msra.gmra.mxu2 %v2121_v27  ;;  %v2083_v27 = vld [vmem:[%s2765_s5 + $0x50] sm:$0xff] }
  0x7b   : > { %2155 = vmatpush.bf16.msrb.mxu3 %v2095_v4 }
  0x7f   : > { %2156 = vmatpush.bf16.msrb.mxu3 %v2094_v7  ;;  %v2106_v7 = vld [vmem:[%s2765_s5 + $0x58] sm:$0xff] }
  0x83   : > { %2157 = vmatpush.bf16.msrb.mxu3 %v2093_v10 }
  0x86   : > { %562 = vmatmul.bf16.gmra.mxu0 %v2098_v28  ;;  %622 = vmatmul.bf16.gmra.mxu3 %v2110_v29  ;;  %v2131_v28 = vld [vmem:[%s2765_s5 + $0x70] sm:$0xff] }
  0x87   : > { %2158 = vmatpush.bf16.msrb.mxu3 %v2092_v13  ;;  %795 = vmatmul.bf16.gmra.mxu1 %v2074_v30 }
  0x88   : > { %1078 = vmatmul.bf16.gmra.mxu2 %v2122_v31 }
  0x8b   : > { %2159 = vmatpush.bf16.msrb.mxu3 %v2091_v16 }
  0x8f   : > { %2160 = vmatpush.bf16.msrb.mxu3 %v2090_v19 }
  0x93   : > { %2161 = vmatpush.bf16.msrb.mxu3 %v2089_v22 }
  0x96   : > { %567 = vmatmul.bf16.gmra.mxu0 %v2099_v32  ;;  %627 = vmatmul.bf16.gmra.mxu3 %v2111_v33 }
  0x97   : > { %2162 = vmatpush.bf16.msra.mxu3 %v2791_v2  ;;  %800 = vmatmul.bf16.gmra.mxu1 %v2075_v34 }
  0x98   : > { %1083 = vmatmul.bf16.gmra.mxu2 %v2123_v35 }
  0x9b   : > { %2163 = vmatpush.bf16.msra.mxu3 %v2797_v5 }
  0x9f   : > { %2164 = vmatpush.bf16.msra.mxu3 %v2803_v8  ;;  %v2134_v8 = vld [vmem:[%s2765_s5 + $0x88] sm:$0xff] }
  0xa3   : > { %2165 = vmatpush.bf16.msra.mxu3 %v2809_v11  ;;  %v2082_v11 = vld [vmem:[%s2765_s5 + $0x48] sm:$0xff] }
  0xa6   : > { %572 = vmatmul.bf16.gmra.mxu0 %v2100_v36  ;;  %632 = vmatmul.bf16.gmra.mxu3 %v2112_v37 }
  0xa7   : > { %2166 = vmatpush.bf16.msra.mxu3 %v2815_v14  ;;  %805 = vmatmul.bf16.gmra.mxu1 %v2076_v38 }
  0xa8   : > { %1088 = vmatmul.bf16.gmra.mxu2 %v2124_v39  ;;  %v2108_v39 = vld [vmem:[%s2765_s5 + $0x68] sm:$0xff] }
  0xab   : > { %2167 = vmatpush.bf16.msra.mxu3 %v2821_v17 }
  0xaf   : > { %2168 = vmatpush.bf16.msra.mxu3 %v2138_v20 }
  0xb3   : > { %2169 = vmatpush.bf16.msra.mxu3 %v2137_v23  ;;  %v2107_v23 = vld [vmem:[%s2765_s5 + $0x60] sm:$0xff] }
  0xb6   : > { %577 = vmatmul.bf16.gmra.mxu0 %v2101_v40  ;;  %850 = vmatmul.bf16.vlgmr.msrb.gmra.mxu3 %v2085_v41  ;;  %v2136_v40 = vld [vmem:[%s2765_s5 + $0x98] sm:$0xff] }
  0xb7   : > { %810 = vmatmul.bf16.gmra.mxu1 %v2077_v42 }
  0xb8   : > { %1093 = vmatmul.bf16.gmra.mxu2 %v2125_v43  ;;  %v2084_v43 = vld [vmem:[%s2765_s5 + $0x58] sm:$0xff] }
  0xc6   : > { %582 = vmatmul.bf16.gmra.mxu0 %v2102_v44  ;;  %855 = vmatmul.bf16.gmra.mxu3 %v2086_v45  ;;  %v2132_v44 = vld [vmem:[%s2765_s5 + $0x78] sm:$0xff] }
  0xc7   : > { %815 = vmatmul.bf16.gmra.mxu1 %v2078_v46 }
  0xc8   : > { %1098 = vmatmul.bf16.gmra.mxu2 %v2126_v47 }
  0xd6   : > { %587 = vmatmul.bf16.gmra.mxu0 %v2103_v48  ;;  %860 = vmatmul.bf16.gmra.mxu3 %v2087_v49 }
  0xd7   : > { %820 = vmatmul.bf16.gmra.mxu1 %v2079_v50 }
  0xd8   : > { %1103 = vmatmul.bf16.gmra.mxu2 %v2127_v51 }
  0xe6   : > { %592 = vmatmul.bf16.gmra.mxu0 %v2104_v52  ;;  %865 = vmatmul.bf16.gmra.mxu3 %v2088_v53 }
  0xe7   : > { %825 = vmatmul.bf16.gmra.mxu1 %v2080_v54 }
  0xe8   : > { %1108 = vmatmul.bf16.gmra.mxu2 %v2128_v55 }
  0xf3   : > { %v558_v58 = vpop.f32.mrf.mxu0 }
  0xf4   : > { %v791_v61 = vpop.f32.mrf.mxu1 }
  0xf5   : > { %v792_v62 = vadd.f32 %v791_v61, %v558_v58 }
  0xf6   : > { %597 = vmatmul.bf16.gmra.mxu0 %v2105_v56  ;;  %1133 = vmatmul.bf16.vlgmr.msra.gmra.mxu3 %v2133_v57 }
  0xf7   : > { %830 = vmatmul.bf16.gmra.mxu1 %v2081_v59 }
  0xf8   : > { %1113 = vmatmul.bf16.gmra.mxu2 %v2129_v60 }
  0xf9   : > { %v2872_v63 = vpop.f32.mrf.mxu3 }
  0xfb   : > { %v1074_v0 = vpop.f32.mrf.mxu2  ;;  %v560_v2 = vpop.f32.mrf.mxu0 }
  0xfc   : > { %v2874_v1 = vadd.f32 %v1074_v0, %v792_v62  ;;  %v793_v3 = vpop.f32.mrf.mxu1 }
  0xfd   : > { %v794_v4 = vadd.f32 %v793_v3, %v560_v2 }
 0x101   : > { %v2876_v5 = vpop.f32.mrf.mxu3 }
 0x103   : > { %v1076_v6 = vpop.f32.mrf.mxu2  ;;  %v563_v10 = vpop.f32.mrf.mxu0 }
 0x104   : > { %v2880_v9 = vadd.f32 %v1076_v6, %v794_v4  ;;  %v796_v13 = vpop.f32.mrf.mxu1 }
 0x105   : > { %v797_v14 = vadd.f32 %v796_v13, %v563_v10 }
 0x106   : > { %602 = vmatmul.bf16.gmra.mxu0 %v2106_v7  ;;  %1138 = vmatmul.bf16.gmra.mxu3 %v2134_v8 }
 0x107   : > { %835 = vmatmul.bf16.gmra.mxu1 %v2082_v11 }
 0x108   : > { %1118 = vmatmul.bf16.gmra.mxu2 %v2130_v12 }
 0x109   : > { %v2884_v15 = vpop.f32.mrf.mxu3 }
 0x10b   : > { %v1079_v16 = vpop.f32.mrf.mxu2  ;;  %v565_v18 = vpop.f32.mrf.mxu0 }
 0x10c   : > { %v2886_v17 = vadd.f32 %v1079_v16, %v797_v14  ;;  %v798_v19 = vpop.f32.mrf.mxu1 }
 0x10d   : > { %v799_v20 = vadd.f32 %v798_v19, %v565_v18 }
 0x111   : > { %v2888_v21 = vpop.f32.mrf.mxu3 }
 0x113   : > { %v1081_v22 = vpop.f32.mrf.mxu2  ;;  %v568_v26 = vpop.f32.mrf.mxu0 }
 0x114   : > { %v2892_v25 = vadd.f32 %v1081_v22, %v799_v20  ;;  %v801_v29 = vpop.f32.mrf.mxu1 }
 0x115   : > { %v802_v30 = vadd.f32 %v801_v29, %v568_v26 }
 0x116   : > { %607 = vmatmul.bf16.gmra.mxu0 %v2107_v23  ;;  %1143 = vmatmul.bf16.gmra.mxu3 %v2135_v24 }
 0x117   : > { %840 = vmatmul.bf16.gmra.mxu1 %v2083_v27 }
 0x118   : > { %1123 = vmatmul.bf16.gmra.mxu2 %v2131_v28 }
 0x119   : > { %v628_v31 = vpop.f32.mrf.mxu3 }
 0x11b   : > { %v1084_v32 = vpop.f32.mrf.mxu2  ;;  %v570_v34 = vpop.f32.mrf.mxu0 }
 0x11c   : > { %v2896_v33 = vadd.f32 %v1084_v32, %v802_v30  ;;  %v803_v35 = vpop.f32.mrf.mxu1 }
 0x11d   : > { %v804_v36 = vadd.f32 %v803_v35, %v570_v34 }
 0x121   : > { %v630_v37 = vpop.f32.mrf.mxu3 }
 0x123   : > { %v1086_v38 = vpop.f32.mrf.mxu2  ;;  %v573_v42 = vpop.f32.mrf.mxu0 }
 0x124   : > { %v2900_v41 = vadd.f32 %v1086_v38, %v804_v36  ;;  %v806_v45 = vpop.f32.mrf.mxu1 }
 0x125   : > { %v807_v46 = vadd.f32 %v806_v45, %v573_v42 }
 0x126   : > { %612 = vmatmul.bf16.gmra.mxu0 %v2108_v39  ;;  %1148 = vmatmul.bf16.gmra.mxu3 %v2136_v40 }
 0x127   : > { %845 = vmatmul.bf16.gmra.mxu1 %v2084_v43 }
 0x128   : > { %1128 = vmatmul.bf16.gmra.mxu2 %v2132_v44 }
 0x129   : > { %v633_v47 = vpop.f32.mrf.mxu3 }
 0x12b   : > { %v1089_v48 = vpop.f32.mrf.mxu2  ;;  %v575_v50 = vpop.f32.mrf.mxu0 }
 0x12c   : > { %v2904_v49 = vadd.f32 %v1089_v48, %v807_v46  ;;  %v808_v51 = vpop.f32.mrf.mxu1 }
 0x12d   : > { %v809_v52 = vadd.f32 %v808_v51, %v575_v50 }
 0x131   : > { %v2906_v53 = vpop.f32.mrf.mxu3 }
 0x133   : > { %v1091_v54 = vpop.f32.mrf.mxu2  ;;  %v578_v56 = vpop.f32.mrf.mxu0 }
 0x134   : > { %v2908_v55 = vadd.f32 %v1091_v54, %v809_v52  ;;  %v811_v57 = vpop.f32.mrf.mxu1 }
 0x135   : > { %v812_v58 = vadd.f32 %v811_v57, %v578_v56 }
 0x139   : > { %v851_v59 = vpop.f32.mrf.mxu3 }
 0x13a   : > { %v852_v60 = vadd.f32 %v851_v59, %v2872_v63 }
 0x13b   : > { %v1094_v61 = vpop.f32.mrf.mxu2  ;;  %v580_v0 = vpop.f32.mrf.mxu0 }
 0x13c   : > { %v2911_v62 = vadd.f32 %v1094_v61, %v812_v58  ;;  %v813_v2 = vpop.f32.mrf.mxu1 }
 0x13d   : > { %v814_v3 = vadd.f32 %v813_v2, %v580_v0 }
 0x141   : > { %v853_v4 = vpop.f32.mrf.mxu3 }
 0x142   : > { %v854_v6 = vadd.f32 %v853_v4, %v2876_v5 }
 0x143   : > { %v1096_v7 = vpop.f32.mrf.mxu2  ;;  %v583_v10 = vpop.f32.mrf.mxu0 }
 0x144   : > { %v2914_v8 = vadd.f32 %v1096_v7, %v814_v3  ;;  %v816_v11 = vpop.f32.mrf.mxu1 }
 0x145   : > { %v817_v12 = vadd.f32 %v816_v11, %v583_v10 }
 0x149   : > { %v856_v13 = vpop.f32.mrf.mxu3 }
 0x14a   : > { %v857_v14 = vadd.f32 %v856_v13, %v2884_v15 }
 0x14b   : > { %v1099_v16 = vpop.f32.mrf.mxu2  ;;  %v585_v18 = vpop.f32.mrf.mxu0 }
 0x14c   : > { %v2917_v63 = vadd.f32 %v1099_v16, %v817_v12  ;;  %v818_v19 = vpop.f32.mrf.mxu1 }
 0x14d   : > { %v819_v20 = vadd.f32 %v818_v19, %v585_v18 }
 0x151   : > { %v858_v22 = vpop.f32.mrf.mxu3 }
 0x152   : > { %v859_v23 = vadd.f32 %v858_v22, %v2888_v21 }
 0x153   : > { %v1101_v24 = vpop.f32.mrf.mxu2  ;;  %v588_v26 = vpop.f32.mrf.mxu0 }
 0x154   : > { %v2920_v5 = vadd.f32 %v1101_v24, %v819_v20  ;;  %v821_v27 = vpop.f32.mrf.mxu1 }
 0x155   : > { %v822_v28 = vadd.f32 %v821_v27, %v588_v26 }
 0x159   : > { %v861_v29 = vpop.f32.mrf.mxu3 }
 0x15a   : > { %v862_v30 = vadd.f32 %v861_v29, %v628_v31 }
 0x15b   : > { %v1104_v32 = vpop.f32.mrf.mxu2  ;;  %v590_v15 = vpop.f32.mrf.mxu0 }
 0x15c   : > { %v2922_v34 = vadd.f32 %v1104_v32, %v822_v28  ;;  %v823_v35 = vpop.f32.mrf.mxu1 }
 0x15d   : > { %v824_v36 = vadd.f32 %v823_v35, %v590_v15 }
 0x161   : > { %v863_v38 = vpop.f32.mrf.mxu3 }
 0x162   : > { %v864_v39 = vadd.f32 %v863_v38, %v630_v37 }
 0x163   : > { %v1106_v40 = vpop.f32.mrf.mxu2  ;;  %v593_v21 = vpop.f32.mrf.mxu0 }
 0x164   : > { %v2924_v42 = vadd.f32 %v1106_v40, %v824_v36  ;;  %v826_v43 = vpop.f32.mrf.mxu1 }
 0x165   : > { %v827_v44 = vadd.f32 %v826_v43, %v593_v21 }
 0x169   : > { %v866_v45 = vpop.f32.mrf.mxu3 }
 0x16a   : > { %v867_v46 = vadd.f32 %v866_v45, %v633_v47 }
 0x16b   : > { %v1109_v48 = vpop.f32.mrf.mxu2  ;;  %v595_v31 = vpop.f32.mrf.mxu0 }
 0x16c   : > { %v2926_v50 = vadd.f32 %v1109_v48, %v827_v44  ;;  %v828_v51 = vpop.f32.mrf.mxu1 }
 0x16d   : > { %v829_v52 = vadd.f32 %v828_v51, %v595_v31 }
 0x171   : > { %v868_v54 = vpop.f32.mrf.mxu3 }
 0x173   : > { %v1111_v56 = vpop.f32.mrf.mxu2  ;;  %v598_v58 = vpop.f32.mrf.mxu0 }
 0x174   : > { %v2928_v57 = vadd.f32 %v1111_v56, %v829_v52  ;;  %v831_v37 = vpop.f32.mrf.mxu1 }
 0x175   : > { %v832_v59 = vadd.f32 %v831_v37, %v598_v58 }
 0x179   : > { %v1134_v61 = vpop.f32.mrf.mxu3 }
 0x17a   : > { %v2930_v2 = vadd.f32 %v1134_v61, %v852_v60 }
 0x17b   : > { %v1114_v0 = vpop.f32.mrf.mxu2  ;;  %v600_v47 = vpop.f32.mrf.mxu0 }
 0x17c   : > { %v2932_v3 = vadd.f32 %v1114_v0, %v832_v59  ;;  %v833_v4 = vpop.f32.mrf.mxu1 }
 0x17d   : > { %v834_v7 = vadd.f32 %v833_v4, %v600_v47 }
 0x181   : > { %v1136_v10 = vpop.f32.mrf.mxu3 }
 0x182   : > { %v2934_v12 = vadd.f32 %v1136_v10, %v854_v6 }
 0x183   : > { %v1116_v11 = vpop.f32.mrf.mxu2  ;;  %v603_v16 = vpop.f32.mrf.mxu0 }
 0x184   : > { %v2936_v13 = vadd.f32 %v1116_v11, %v834_v7  ;;  %v836_v18 = vpop.f32.mrf.mxu1  ;;  %v869_v7 = vadd.f32 %v868_v54, %v2906_v53 }
 0x185   : > { %v837_v19 = vadd.f32 %v836_v18, %v603_v16 }
 0x189   : > { %v1139_v20 = vpop.f32.mrf.mxu3 }
 0x18a   : > { %v2938_v24 = vadd.f32 %v1139_v20, %v857_v14 }
 0x18b   : > { %v1119_v22 = vpop.f32.mrf.mxu2  ;;  %v605_v26 = vpop.f32.mrf.mxu0 }
 0x18c   : > { %v2940_v60 = vadd.f32 %v1119_v22, %v837_v19  ;;  %v838_v27 = vpop.f32.mrf.mxu1 }
 0x18d   : > { %v839_v28 = vadd.f32 %v838_v27, %v605_v26 }
 0x191   : > { %v1141_v29 = vpop.f32.mrf.mxu3 }
 0x192   : > { %v2942_v15 = vadd.f32 %v1141_v29, %v859_v23 }
 0x193   : > { %v1121_v32 = vpop.f32.mrf.mxu2  ;;  %v608_v35 = vpop.f32.mrf.mxu0 }
 0x194   : > { %v2944_v6 = vadd.f32 %v1121_v32, %v839_v28  ;;  %v841_v36 = vpop.f32.mrf.mxu1 }
 0x195   : > { %v842_v38 = vadd.f32 %v841_v36, %v608_v35 }
 0x199   : > { %v1144_v40 = vpop.f32.mrf.mxu3 }
 0x19a   : > { %v2946_v43 = vadd.f32 %v1144_v40, %v862_v30 }
 0x19b   : > { %v1124_v21 = vpop.f32.mrf.mxu2  ;;  %v610_v44 = vpop.f32.mrf.mxu0 }
 0x19c   : > { %v2948_v14 = vadd.f32 %v1124_v21, %v842_v38  ;;  %v843_v45 = vpop.f32.mrf.mxu1 }
 0x19d   : > { %v844_v48 = vadd.f32 %v843_v45, %v610_v44 }
 0x1a1   : > { %v1146_v31 = vpop.f32.mrf.mxu3 }
 0x1a2   : > { %v2950_v52 = vadd.f32 %v1146_v31, %v864_v39 }
 0x1a3   : > { %v1126_v51 = vpop.f32.mrf.mxu2  ;;  %v613_v56 = vpop.f32.mrf.mxu0 }
 0x1a4   : > { %v2952_v23 = vadd.f32 %v1126_v51, %v844_v48  ;;  %v846_v58 = vpop.f32.mrf.mxu1 }
 0x1a5   : > { %v847_v37 = vadd.f32 %v846_v58, %v613_v56 }
 0x1a9   : > { %v1149_v59 = vpop.f32.mrf.mxu3 }
 0x1aa   : > { %v2954_v0 = vadd.f32 %v1149_v59, %v867_v46 }
 0x1ab   : > { %v1129_v61 = vpop.f32.mrf.mxu2  ;;  %v615_v47 = vpop.f32.mrf.mxu0 }
 0x1ac   : > { %v2956_v30 = vadd.f32 %v1129_v61, %v847_v37  ;;  %v848_v4 = vpop.f32.mrf.mxu1 }
 0x1ad   : > { %v849_v10 = vadd.f32 %v848_v4, %v615_v47 }
 0x1b0   : > { %1189 = sbr.rel (%p2065_p8) target bundleno = 469 (0x1d5), region = 48 }
 0x1b1   : > { %v1151_v11 = vpop.f32.mrf.mxu3 }
 0x1b2   : > { %v2959_v16 = vadd.f32 %v1151_v11, %v869_v7 }
 0x1b3   : > { %v1131_v39 = vpop.f32.mrf.mxu2 }
 0x1b4   : > { %v2961_v18 = vadd.f32 %v1131_v39, %v849_v10 }
 0x1b5   : > { %1190 = vst [vmem:[#allocation2 + $0xb0] sm:$0xff] %v2874_v1 }
 0x1b6   : > { %1191 = vst [vmem:[#allocation2] sm:$0xff] %v2880_v9 }
 0x1b7   : > { %1192 = vst [vmem:[#allocation2 + $0xd8] sm:$0xff] %v2886_v17 }
 0x1b8   : > { %1193 = vst [vmem:[#allocation2 + $0x18] sm:$0xff] %v2892_v25 }
 0x1b9   : > { %1194 = vst [vmem:[#allocation2 + $0x50] sm:$0xff] %v2896_v33 }
 0x1ba   : > { %1195 = vst [vmem:[#allocation2 + $0x68] sm:$0xff] %v2900_v41 }
 0x1bb   : > { %1196 = vst [vmem:[#allocation2 + $0x30] sm:$0xff] %v2904_v49 }
 0x1bc   : > { %1197 = vst [vmem:[#allocation2 + $0x48] sm:$0xff] %v2908_v55 }
 0x1bd   : > { %1198 = vst [vmem:[#allocation2 + $0x80] sm:$0xff] %v2911_v62 }
 0x1be   : > { %1199 = vst [vmem:[#allocation2 + $0x88] sm:$0xff] %v2914_v8 }
 0x1bf   : > { %1200 = vst [vmem:[#allocation2 + $0xe8] sm:$0xff] %v2917_v63 }
 0x1c0   : > { %1201 = vst [vmem:[#allocation2 + $0xb8] sm:$0xff] %v2920_v5 }
 0x1c1   : > { %1202 = vst [vmem:[#allocation2 + $0x60] sm:$0xff] %v2922_v34 }
 0x1c2   : > { %1203 = vst [vmem:[#allocation2 + $0xf0] sm:$0xff] %v2924_v42 }
 0x1c3   : > { %1204 = vst [vmem:[#allocation2 + $0x8] sm:$0xff] %v2926_v50 }
 0x1c4   : > { %1205 = vst [vmem:[#allocation2 + $0x78] sm:$0xff] %v2928_v57 }
 0x1c5   : > { %1206 = vst [vmem:[#allocation2 + $0x38] sm:$0xff] %v2932_v3 }
 0x1c6   : > { %1207 = vst [vmem:[#allocation2 + $0x58] sm:$0xff] %v2936_v13 }
 0x1c7   : > { %1208 = vst [vmem:[#allocation2 + $0x40] sm:$0xff] %v2940_v60 }
 0x1c8   : > { %1209 = vst [vmem:[#allocation2 + $0xc8] sm:$0xff] %v2944_v6 }
 0x1c9   : > { %1210 = vst [vmem:[#allocation2 + $0xe0] sm:$0xff] %v2948_v14 }
 0x1ca   : > { %1211 = vst [vmem:[#allocation2 + $0x90] sm:$0xff] %v2952_v23 }
 0x1cb   : > { %1212 = vst [vmem:[#allocation2 + $0x70] sm:$0xff] %v2956_v30 }
 0x1cc   : > { %1213 = vst [vmem:[#allocation2 + $0xc0] sm:$0xff] %v2961_v18 }
 0x1cd   : > { %1214 = vst [vmem:[#allocation2 + $0xa8] sm:$0xff] %v2930_v2 }
 0x1ce   : > { %1215 = vst [vmem:[#allocation2 + $0xd0] sm:$0xff] %v2934_v12 }
 0x1cf   : > { %1216 = vst [vmem:[#allocation2 + $0x10] sm:$0xff] %v2938_v24 }
 0x1d0   : > { %1217 = vst [vmem:[#allocation2 + $0x28] sm:$0xff] %v2942_v15 }
 0x1d1   : > { %1218 = vst [vmem:[#allocation2 + $0xa0] sm:$0xff] %v2946_v43 }
 0x1d2   : > { %1219 = vst [vmem:[#allocation2 + $0xf8] sm:$0xff] %v2950_v52 }
 0x1d3   : > { %1220 = vst [vmem:[#allocation2 + $0x20] sm:$0xff] %v2954_v0 }
 0x1d4   : > { %1221 = vst [vmem:[#allocation2 + $0x98] sm:$0xff] %v2959_v16 }
 0x1d5 PF: > { %s3275_s4 = sld [smem:[#allocation19_spill]] }
 0x1db   : > { %p1222_p12 = scmp.gt.s32.totalorder %s3275_s4, 0  ;;  %p1223_p13 = scmp.lt.s32.totalorder %s3275_s4, 2 }
 0x1dd   : > { %p1224_p5 = pnand %p1223_p13, %p1222_p12 }
 0x1df   : > { %1227 = sbr.rel (%p1224_p5) target bundleno = 519 (0x207), region = 52 }
 0x1e4   : > { %v1228_v53 = vld [vmem:[#allocation2 + $0xb0] sm:$0xff]  ;;  %v1229_v46 = vld [vmem:[#allocation2] sm:$0xff]  ;;  %v1230_v54 = vld [vmem:[#allocation2 + $0xd8] sm:$0xff] }
 0x1e5   : > { %v1260_v19 = vadd.f32 %v1228_v53, %v2874_v1  ;;  %v1261_v20 = vadd.f32 %v1229_v46, %v2880_v9  ;;  %v1262_v22 = vadd.f32 %v1230_v54, %v2886_v17  ;;  %v1231_v26 = vld [vmem:[#allocation2 + $0x18] sm:$0xff]  ;;  %v1232_v27 = vld [vmem:[#allocation2 + $0x50] sm:$0xff]  ;;  %v1233_v28 = vld [vmem:[#allocation2 + $0x68] sm:$0xff] }
 0x1e6   : > { %v1263_v29 = vadd.f32 %v1231_v26, %v2892_v25  ;;  %v1234_v32 = vld [vmem:[#allocation2 + $0x30] sm:$0xff]  ;;  %v1264_v35 = vadd.f32 %v1232_v27, %v2896_v33  ;;  %v1235_v36 = vld [vmem:[#allocation2 + $0x48] sm:$0xff]  ;;  %v1265_v38 = vadd.f32 %v1233_v28, %v2900_v41  ;;  %v1236_v40 = vld [vmem:[#allocation2 + $0x80] sm:$0xff] }
 0x1e7   : > { %1292 = vst [vmem:[#allocation2 + $0xb0] sm:$0xff] %v1260_v19  ;;  %v1266_v21 = vadd.f32 %v1234_v32, %v2904_v49  ;;  %v1237_v44 = vld [vmem:[#allocation2 + $0x88] sm:$0xff]  ;;  %v1267_v45 = vadd.f32 %v1235_v36, %v2908_v55  ;;  %v1268_v31 = vadd.f32 %v1236_v40, %v2911_v62  ;;  %v1239_v51 = vld [vmem:[#allocation2 + $0xb8] sm:$0xff]  ;;  %v1240_v58 = vld [vmem:[#allocation2 + $0x60] sm:$0xff] }
 0x1e8   : > { %1293 = vst [vmem:[#allocation2] sm:$0xff] %v1261_v20  ;;  %v1238_v48 = vld [vmem:[#allocation2 + $0xe8] sm:$0xff]  ;;  %v1269_v56 = vadd.f32 %v1237_v44, %v2914_v8  ;;  %v1241_v59 = vld [vmem:[#allocation2 + $0xf0] sm:$0xff]  ;;  %v1271_v61 = vadd.f32 %v1239_v51, %v2920_v5  ;;  %v1272_v4 = vadd.f32 %v1240_v58, %v2922_v34  ;;  %v1243_v7 = vld [vmem:[#allocation2 + $0x78] sm:$0xff] }
 0x1e9   : > { %1294 = vst [vmem:[#allocation2 + $0xd8] sm:$0xff] %v1262_v22  ;;  %v1270_v37 = vadd.f32 %v1238_v48, %v2917_v63  ;;  %v1242_v47 = vld [vmem:[#allocation2 + $0x8] sm:$0xff]  ;;  %v1273_v10 = vadd.f32 %v1241_v59, %v2924_v42  ;;  %v1244_v11 = vld [vmem:[#allocation2 + $0x38] sm:$0xff]  ;;  %v1275_v46 = vadd.f32 %v1243_v7, %v2928_v57  ;;  %v1246_v54 = vld [vmem:[#allocation2 + $0x40] sm:$0xff] }
 0x1ea   : > { %1295 = vst [vmem:[#allocation2 + $0x18] sm:$0xff] %v1263_v29  ;;  %v1274_v39 = vadd.f32 %v1242_v47, %v2926_v50  ;;  %v1245_v53 = vld [vmem:[#allocation2 + $0x58] sm:$0xff]  ;;  %v1276_v19 = vadd.f32 %v1244_v11, %v2932_v3  ;;  %v1247_v20 = vld [vmem:[#allocation2 + $0xc8] sm:$0xff]  ;;  %v1248_v26 = vld [vmem:[#allocation2 + $0xe0] sm:$0xff]  ;;  %v1278_v27 = vadd.f32 %v1246_v54, %v2940_v60 }
 0x1eb   : > { %1296 = vst [vmem:[#allocation2 + $0x50] sm:$0xff] %v1264_v35  ;;  %v1277_v22 = vadd.f32 %v1245_v53, %v2936_v13  ;;  %v1249_v28 = vld [vmem:[#allocation2 + $0x90] sm:$0xff]  ;;  %v1279_v29 = vadd.f32 %v1247_v20, %v2944_v6  ;;  %v1280_v35 = vadd.f32 %v1248_v26, %v2948_v14  ;;  %v1251_v36 = vld [vmem:[#allocation2 + $0xc0] sm:$0xff]  ;;  %v1252_v40 = vld [vmem:[#allocation2 + $0xa8] sm:$0xff] }
 0x1ec   : > { %1297 = vst [vmem:[#allocation2 + $0x68] sm:$0xff] %v1265_v38  ;;  %v1250_v32 = vld [vmem:[#allocation2 + $0x70] sm:$0xff]  ;;  %v1281_v38 = vadd.f32 %v1249_v28, %v2952_v23  ;;  %v1255_v51 = vld [vmem:[#allocation2 + $0x28] sm:$0xff]  ;;  %v1256_v58 = vld [vmem:[#allocation2 + $0xa0] sm:$0xff] }
 0x1ed   : > { %1298 = vst [vmem:[#allocation2 + $0x30] sm:$0xff] %v1266_v21  ;;  %v1282_v21 = vadd.f32 %v1250_v32, %v2956_v30  ;;  %v1253_v44 = vld [vmem:[#allocation2 + $0xd0] sm:$0xff]  ;;  %v1257_v59 = vld [vmem:[#allocation2 + $0xf8] sm:$0xff]  ;;  %v1258_v47 = vld [vmem:[#allocation2 + $0x20] sm:$0xff] }
 0x1ee   : > { %1299 = vst [vmem:[#allocation2 + $0x48] sm:$0xff] %v1267_v45  ;;  %v1283_v45 = vadd.f32 %v1251_v36, %v2961_v18  ;;  %v1254_v48 = vld [vmem:[#allocation2 + $0x10] sm:$0xff]  ;;  %v1259_v7 = vld [vmem:[#allocation2 + $0x98] sm:$0xff]  ;;  %v1290_v11 = vadd.f32 %v1258_v47, %v2954_v0 }
 0x1ef   : > { %1300 = vst [vmem:[#allocation2 + $0x80] sm:$0xff] %v1268_v31  ;;  %v1284_v31 = vadd.f32 %v1252_v40, %v2930_v2 }
 0x1f0   : > { %1301 = vst [vmem:[#allocation2 + $0x88] sm:$0xff] %v1269_v56  ;;  %v1285_v56 = vadd.f32 %v1253_v44, %v2934_v12 }
 0x1f1   : > { %1302 = vst [vmem:[#allocation2 + $0xe8] sm:$0xff] %v1270_v37  ;;  %v1286_v37 = vadd.f32 %v1254_v48, %v2938_v24 }
 0x1f2   : > { %1303 = vst [vmem:[#allocation2 + $0xb8] sm:$0xff] %v1271_v61  ;;  %v1287_v61 = vadd.f32 %v1255_v51, %v2942_v15 }
 0x1f3   : > { %1304 = vst [vmem:[#allocation2 + $0x60] sm:$0xff] %v1272_v4  ;;  %v1288_v4 = vadd.f32 %v1256_v58, %v2946_v43 }
 0x1f4   : > { %1305 = vst [vmem:[#allocation2 + $0xf0] sm:$0xff] %v1273_v10  ;;  %v1289_v10 = vadd.f32 %v1257_v59, %v2950_v52 }
 0x1f5   : > { %1306 = vst [vmem:[#allocation2 + $0x8] sm:$0xff] %v1274_v39  ;;  %v1291_v39 = vadd.f32 %v1259_v7, %v2959_v16 }
 0x1f6   : > { %1307 = vst [vmem:[#allocation2 + $0x78] sm:$0xff] %v1275_v46 }
 0x1f7   : > { %1308 = vst [vmem:[#allocation2 + $0x38] sm:$0xff] %v1276_v19 }
 0x1f8   : > { %1309 = vst [vmem:[#allocation2 + $0x58] sm:$0xff] %v1277_v22 }
 0x1f9   : > { %1310 = vst [vmem:[#allocation2 + $0x40] sm:$0xff] %v1278_v27 }
 0x1fa   : > { %1311 = vst [vmem:[#allocation2 + $0xc8] sm:$0xff] %v1279_v29 }
 0x1fb   : > { %1312 = vst [vmem:[#allocation2 + $0xe0] sm:$0xff] %v1280_v35 }
 0x1fc   : > { %1313 = vst [vmem:[#allocation2 + $0x90] sm:$0xff] %v1281_v38 }
 0x1fd   : > { %1314 = vst [vmem:[#allocation2 + $0x70] sm:$0xff] %v1282_v21 }
 0x1fe   : > { %1315 = vst [vmem:[#allocation2 + $0xc0] sm:$0xff] %v1283_v45 }
 0x1ff   : > { %1316 = vst [vmem:[#allocation2 + $0xa8] sm:$0xff] %v1284_v31 }
 0x200   : > { %1317 = vst [vmem:[#allocation2 + $0xd0] sm:$0xff] %v1285_v56 }
 0x201   : > { %1318 = vst [vmem:[#allocation2 + $0x10] sm:$0xff] %v1286_v37 }
 0x202   : > { %1319 = vst [vmem:[#allocation2 + $0x28] sm:$0xff] %v1287_v61 }
 0x203   : > { %1320 = vst [vmem:[#allocation2 + $0xa0] sm:$0xff] %v1288_v4 }
 0x204   : > { %1321 = vst [vmem:[#allocation2 + $0xf8] sm:$0xff] %v1289_v10 }
 0x205   : > { %1322 = vst [vmem:[#allocation2 + $0x20] sm:$0xff] %v1290_v11 }
 0x206   : > { %1323 = vst [vmem:[#allocation2 + $0x98] sm:$0xff] %v1291_v39 }
 0x207 PF: > { %s3276_s28 = sld [smem:[#allocation19_spill]] }
 0x20d   : > { %p2066_p9 = scmp.ne.s32.totalorder %s3276_s28, 2 }
 0x20f   : > { %1327 = sbr.rel (%p2066_p9) target bundleno = 573 (0x23d), region = 56 }
 0x214   : > { %v1328_v53 = vld [vmem:[#allocation2 + $0xb0] sm:$0xff]  ;;  %v3034_v46 = vld [vmem:[#allocation8] ss:$0 sm:$0xff]  ;;  %v3037_v19 = vld [vmem:[#allocation8 + $0x1] ss:$0 sm:$0xff] }
 0x215   : > { %v1360_v54 = vadd.f32 %v1328_v53, %v2874_v1  ;;  %v1329_v20 = vld [vmem:[#allocation2] sm:$0xff]  ;;  %v1330_v26 = vld [vmem:[#allocation2 + $0xd8] sm:$0xff]  ;;  %v1332_v28 = vld [vmem:[#allocation2 + $0x50] sm:$0xff] }
 0x216   : > { %v1361_v22 = vadd.f32 %v1329_v20, %v2880_v9  ;;  %v1331_v27 = vld [vmem:[#allocation2 + $0x18] sm:$0xff]  ;;  %v1362_v32 = vadd.f32 %v1330_v26, %v2886_v17  ;;  %v1364_v36 = vadd.f32 %v1332_v28, %v2896_v33  ;;  %v1333_v38 = vld [vmem:[#allocation2 + $0x68] sm:$0xff]  ;;  %v1334_v40 = vld [vmem:[#allocation2 + $0x30] sm:$0xff] }
 0x217   : > { %v1394_v29 = vmul.f32 %v3034_v46, %v1360_v54  ;;  %v1363_v35 = vadd.f32 %v1331_v27, %v2892_v25  ;;  %v1335_v21 = vld [vmem:[#allocation2 + $0x48] sm:$0xff]  ;;  %v1365_v44 = vadd.f32 %v1333_v38, %v2900_v41  ;;  %v1366_v9 = vadd.f32 %v1334_v40, %v2904_v49  ;;  %v1336_v49 = vld [vmem:[#allocation2 + $0x80] sm:$0xff]  ;;  %v1339_v39 = vld [vmem:[#allocation2 + $0xb8] sm:$0xff] }
 0x218   : > { %v1395_v1 = vmul.f32 %v3034_v46, %v1361_v22  ;;  %v1367_v45 = vadd.f32 %v1335_v21, %v2908_v55  ;;  %v1396_v31 = vmul.f32 %v3034_v46, %v1362_v32  ;;  %v1398_v25 = vmul.f32 %v3034_v46, %v1364_v36  ;;  %v1337_v61 = vld [vmem:[#allocation2 + $0x88] sm:$0xff]  ;;  %v1340_v53 = vld [vmem:[#allocation2 + $0x60] sm:$0xff]  ;;  %v1341_v27 = vld [vmem:[#allocation2 + $0xf0] sm:$0xff] }
 0x219   : > { %v1428_v48 = vadd.f32 %v3037_v19, %v1394_v29  ;;  %v1397_v17 = vmul.f32 %v3034_v46, %v1363_v35  ;;  %v1399_v51 = vmul.f32 %v3034_v46, %v1365_v44  ;;  %v1400_v56 = vmul.f32 %v3034_v46, %v1366_v9  ;;  %v1338_v11 = vld [vmem:[#allocation2 + $0xe8] sm:$0xff]  ;;  %v1343_v29 = vld [vmem:[#allocation2 + $0x78] sm:$0xff] }
 0x21a   : > { %v1429_v33 = vadd.f32 %v3037_v19, %v1395_v1  ;;  %v1401_v41 = vmul.f32 %v3034_v46, %v1367_v45  ;;  %v1430_v55 = vadd.f32 %v3037_v19, %v1396_v31  ;;  %v1432_v59 = vadd.f32 %v3037_v19, %v1398_v25  ;;  %v1342_v28 = vld [vmem:[#allocation2 + $0x8] sm:$0xff] }
 0x21b   : > { %v1460_v58 = vmax.f32 %v1428_v48, 0.0  ;;  %v1431_v37 = vadd.f32 %v3037_v19, %v1397_v17  ;;  %v1433_v4 = vadd.f32 %v3037_v19, %v1399_v51  ;;  %v1434_v7 = vadd.f32 %v3037_v19, %v1400_v56 }
 0x21c   : > { %v1461_v47 = vmax.f32 %v1429_v33, 0.0  ;;  %v1435_v10 = vadd.f32 %v3037_v19, %v1401_v41  ;;  %v1462_v54 = vmax.f32 %v1430_v55, 0.0  ;;  %v1464_v22 = vmax.f32 %v1432_v59, 0.0  ;;  %v1345_v41 = vld [vmem:[#allocation2 + $0x58] sm:$0xff] }
 0x21d   : > { %1492 = vst [vmem:[%s2964_s26] sm:$0xff] %v1460_v58  ;;  %v1463_v20 = vmax.f32 %v1431_v37, 0.0  ;;  %v1368_v26 = vadd.f32 %v1336_v49, %v2911_v62  ;;  %v1465_v32 = vmax.f32 %v1433_v4, 0.0  ;;  %v1466_v35 = vmax.f32 %v1434_v7, 0.0  ;;  %v1346_v49 = vld [vmem:[#allocation2 + $0x40] sm:$0xff]  ;;  %v1349_v4 = vld [vmem:[#allocation2 + $0x90] sm:$0xff] }
 0x21e   : > { %1493 = vst [vmem:[%s2964_s26 + $0x8] sm:$0xff] %v1461_v47  ;;  %v1467_v36 = vmax.f32 %v1435_v10, 0.0  ;;  %v1369_v38 = vadd.f32 %v1337_v61, %v2914_v8  ;;  %v1370_v21 = vadd.f32 %v1338_v11, %v2917_v63  ;;  %v1371_v1 = vadd.f32 %v1339_v39, %v2920_v5  ;;  %v1347_v61 = vld [vmem:[#allocation2 + $0xc8] sm:$0xff]  ;;  %v1348_v47 = vld [vmem:[#allocation2 + $0xe0] sm:$0xff] }
 0x21f   : > { %1494 = vst [vmem:[%s2964_s26 + $0x10] sm:$0xff] %v1462_v54  ;;  %v1402_v40 = vmul.f32 %v3034_v46, %v1368_v26  ;;  %v1372_v62 = vadd.f32 %v1340_v53, %v2922_v34  ;;  %v1373_v9 = vadd.f32 %v1341_v27, %v2924_v42  ;;  %v1374_v45 = vadd.f32 %v1342_v28, %v2926_v50  ;;  %v1350_v53 = vld [vmem:[#allocation2 + $0x70] sm:$0xff]  ;;  %v1351_v54 = vld [vmem:[#allocation2 + $0xc0] sm:$0xff] }
 0x220   : > { %1495 = vst [vmem:[%s2964_s26 + $0x18] sm:$0xff] %v1463_v20  ;;  %v1403_v44 = vmul.f32 %v3034_v46, %v1369_v38  ;;  %v1375_v8 = vadd.f32 %v1343_v29, %v2928_v57  ;;  %v1404_v31 = vmul.f32 %v3034_v46, %v1370_v21  ;;  %v1405_v63 = vmul.f32 %v3034_v46, %v1371_v1  ;;  %v1344_v57 = vld [vmem:[#allocation2 + $0x38] sm:$0xff] }
 0x221   : > { %1496 = vst [vmem:[%s2964_s26 + $0x20] sm:$0xff] %v1464_v22  ;;  %v1436_v48 = vadd.f32 %v3037_v19, %v1402_v40  ;;  %v1406_v5 = vmul.f32 %v3034_v46, %v1372_v62  ;;  %v1407_v17 = vmul.f32 %v3034_v46, %v1373_v9  ;;  %v1408_v42 = vmul.f32 %v3034_v46, %v1374_v45 }
 0x222   : > { %1497 = vst [vmem:[%s2964_s26 + $0x28] sm:$0xff] %v1465_v32  ;;  %v1437_v34 = vadd.f32 %v3037_v19, %v1403_v44  ;;  %v1409_v50 = vmul.f32 %v3034_v46, %v1375_v8  ;;  %v1438_v33 = vadd.f32 %v3037_v19, %v1404_v31  ;;  %v1439_v51 = vadd.f32 %v3037_v19, %v1405_v63  ;;  %v1353_v8 = vld [vmem:[#allocation2 + $0xd0] sm:$0xff] }
 0x223   : > { %1498 = vst [vmem:[%s2964_s26 + $0x30] sm:$0xff] %v1466_v35  ;;  %v1468_v25 = vmax.f32 %v1436_v48, 0.0  ;;  %v1440_v56 = vadd.f32 %v3037_v19, %v1406_v5  ;;  %v1441_v55 = vadd.f32 %v3037_v19, %v1407_v17  ;;  %v1442_v37 = vadd.f32 %v3037_v19, %v1408_v42  ;;  %v1354_v48 = vld [vmem:[#allocation2 + $0x10] sm:$0xff]  ;;  %v1355_v17 = vld [vmem:[#allocation2 + $0x28] sm:$0xff]  ;;  %v1356_v42 = vld [vmem:[#allocation2 + $0xa0] sm:$0xff] }
 0x224   : > { %1499 = vst [vmem:[%s2964_s26 + $0x38] sm:$0xff] %v1467_v36  ;;  %v1469_v58 = vmax.f32 %v1437_v34, 0.0  ;;  %v1443_v59 = vadd.f32 %v3037_v19, %v1409_v50  ;;  %v1470_v7 = vmax.f32 %v1438_v33, 0.0  ;;  %v1471_v10 = vmax.f32 %v1439_v51, 0.0  ;;  %v1357_v50 = vld [vmem:[#allocation2 + $0xf8] sm:$0xff] }
 0x225   : > { %1500 = vst [vmem:[%s2964_s26 + $0x40] sm:$0xff] %v1468_v25  ;;  %v1472_v11 = vmax.f32 %v1440_v56, 0.0  ;;  %v1376_v39 = vadd.f32 %v1344_v57, %v2932_v3  ;;  %v1473_v20 = vmax.f32 %v1441_v55, 0.0  ;;  %v1474_v22 = vmax.f32 %v1442_v37, 0.0  ;;  %v1358_v56 = vld [vmem:[#allocation2 + $0x20] sm:$0xff] }
 0x226   : > { %1501 = vst [vmem:[%s2964_s26 + $0x48] sm:$0xff] %v1469_v58  ;;  %v1475_v26 = vmax.f32 %v1443_v59, 0.0  ;;  %v1377_v27 = vadd.f32 %v1345_v41, %v2936_v13  ;;  %v1378_v29 = vadd.f32 %v1346_v49, %v2940_v60  ;;  %v1379_v32 = vadd.f32 %v1347_v61, %v2944_v6  ;;  %v1359_v41 = vld [vmem:[#allocation2 + $0x98] sm:$0xff] }
 0x227   : > { %1502 = vst [vmem:[%s2964_s26 + $0x50] sm:$0xff] %v1470_v7  ;;  %v1410_v28 = vmul.f32 %v3034_v46, %v1376_v39  ;;  %v1380_v35 = vadd.f32 %v1348_v47, %v2948_v14  ;;  %v1381_v36 = vadd.f32 %v1349_v4, %v2952_v23  ;;  %v1382_v38 = vadd.f32 %v1350_v53, %v2956_v30 }
 0x228   : > { %1503 = vst [vmem:[%s2964_s26 + $0x58] sm:$0xff] %v1471_v10  ;;  %v1411_v3 = vmul.f32 %v3034_v46, %v1377_v27  ;;  %v1383_v13 = vadd.f32 %v1351_v54, %v2961_v18  ;;  %v1412_v21 = vmul.f32 %v3034_v46, %v1378_v29  ;;  %v1413_v60 = vmul.f32 %v3034_v46, %v1379_v32  ;;  %v1352_v18 = vld [vmem:[#allocation2 + $0xa8] sm:$0xff] }
 0x229   : > { %1504 = vst [vmem:[%s2964_s26 + $0x60] sm:$0xff] %v1472_v11  ;;  %v1444_v40 = vadd.f32 %v3037_v19, %v1410_v28  ;;  %v1414_v6 = vmul.f32 %v3034_v46, %v1380_v35  ;;  %v1415_v1 = vmul.f32 %v3034_v46, %v1381_v36  ;;  %v1416_v23 = vmul.f32 %v3034_v46, %v1382_v38 }
 0x22a   : > { %1505 = vst [vmem:[%s2964_s26 + $0x68] sm:$0xff] %v1473_v20  ;;  %v1445_v14 = vadd.f32 %v3037_v19, %v1411_v3  ;;  %v1417_v30 = vmul.f32 %v3034_v46, %v1383_v13  ;;  %v1446_v44 = vadd.f32 %v3037_v19, %v1412_v21  ;;  %v1447_v9 = vadd.f32 %v3037_v19, %v1413_v60 }
 0x22b   : > { %1506 = vst [vmem:[%s2964_s26 + $0x70] sm:$0xff] %v1474_v22  ;;  %v1476_v62 = vmax.f32 %v1444_v40, 0.0  ;;  %v1448_v45 = vadd.f32 %v3037_v19, %v1414_v6  ;;  %v1449_v63 = vadd.f32 %v3037_v19, %v1415_v1  ;;  %v1450_v5 = vadd.f32 %v3037_v19, %v1416_v23 }
 0x22c   : > { %1507 = vst [vmem:[%s2964_s26 + $0x78] sm:$0xff] %v1475_v26  ;;  %v1477_v31 = vmax.f32 %v1445_v14, 0.0  ;;  %v1451_v34 = vadd.f32 %v3037_v19, %v1417_v30  ;;  %v1478_v57 = vmax.f32 %v1446_v44, 0.0  ;;  %v1479_v25 = vmax.f32 %v1447_v9, 0.0 }
 0x22d   : > { %1508 = vst [vmem:[%s2964_s26 + $0x80] sm:$0xff] %v1476_v62  ;;  %v1480_v33 = vmax.f32 %v1448_v45, 0.0  ;;  %v1384_v51 = vadd.f32 %v1352_v18, %v2930_v2  ;;  %v1481_v49 = vmax.f32 %v1449_v63, 0.0  ;;  %v1482_v58 = vmax.f32 %v1450_v5, 0.0 }
 0x22e   : > { %1509 = vst [vmem:[%s2964_s26 + $0x88] sm:$0xff] %v1477_v31  ;;  %v1483_v55 = vmax.f32 %v1451_v34, 0.0  ;;  %v1385_v37 = vadd.f32 %v1353_v8, %v2934_v12  ;;  %v1386_v61 = vadd.f32 %v1354_v48, %v2938_v24  ;;  %v1387_v47 = vadd.f32 %v1355_v17, %v2942_v15 }
 0x22f   : > { %1510 = vst [vmem:[%s2964_s26 + $0x90] sm:$0xff] %v1478_v57  ;;  %v1418_v59 = vmul.f32 %v3034_v46, %v1384_v51  ;;  %v1388_v4 = vadd.f32 %v1356_v42, %v2946_v43  ;;  %v1389_v7 = vadd.f32 %v1357_v50, %v2950_v52  ;;  %v1390_v10 = vadd.f32 %v1358_v56, %v2954_v0 }
 0x230   : > { %1511 = vst [vmem:[%s2964_s26 + $0x98] sm:$0xff] %v1479_v25  ;;  %v1419_v2 = vmul.f32 %v3034_v46, %v1385_v37  ;;  %v1391_v12 = vadd.f32 %v1359_v41, %v2959_v16  ;;  %v1420_v24 = vmul.f32 %v3034_v46, %v1386_v61  ;;  %v1421_v15 = vmul.f32 %v3034_v46, %v1387_v47 }
 0x231   : > { %1512 = vst [vmem:[%s2964_s26 + $0xa0] sm:$0xff] %v1480_v33  ;;  %v1452_v11 = vadd.f32 %v3037_v19, %v1418_v59  ;;  %v1422_v43 = vmul.f32 %v3034_v46, %v1388_v4  ;;  %v1423_v52 = vmul.f32 %v3034_v46, %v1389_v7  ;;  %v1424_v0 = vmul.f32 %v3034_v46, %v1390_v10 }
 0x232   : > { %1513 = vst [vmem:[%s2964_s26 + $0xa8] sm:$0xff] %v1481_v49  ;;  %v1453_v39 = vadd.f32 %v3037_v19, %v1419_v2  ;;  %v1425_v16 = vmul.f32 %v3034_v46, %v1391_v12  ;;  %v1454_v54 = vadd.f32 %v3037_v19, %v1420_v24  ;;  %v1455_v20 = vadd.f32 %v3037_v19, %v1421_v15 }
 0x233   : > { %1514 = vst [vmem:[%s2964_s26 + $0xb0] sm:$0xff] %v1482_v58  ;;  %v1484_v53 = vmax.f32 %v1452_v11, 0.0  ;;  %v1456_v22 = vadd.f32 %v3037_v19, %v1422_v43  ;;  %v1457_v27 = vadd.f32 %v3037_v19, %v1423_v52  ;;  %v1458_v46 = vadd.f32 %v3037_v19, %v1424_v0 }
 0x234   : > { %1515 = vst [vmem:[%s2964_s26 + $0xb8] sm:$0xff] %v1483_v55  ;;  %v1485_v26 = vmax.f32 %v1453_v39, 0.0  ;;  %v1459_v28 = vadd.f32 %v3037_v19, %v1425_v16  ;;  %v1486_v29 = vmax.f32 %v1454_v54, 0.0  ;;  %v1487_v32 = vmax.f32 %v1455_v20, 0.0 }
 0x235   : > { %1516 = vst [vmem:[%s2964_s26 + $0xc0] sm:$0xff] %v1484_v53  ;;  %v1488_v35 = vmax.f32 %v1456_v22, 0.0  ;;  %v1489_v3 = vmax.f32 %v1457_v27, 0.0  ;;  %v1490_v36 = vmax.f32 %v1458_v46, 0.0 }
 0x236   : > { %1517 = vst [vmem:[%s2964_s26 + $0xc8] sm:$0xff] %v1485_v26  ;;  %v1491_v38 = vmax.f32 %v1459_v28, 0.0 }
 0x237   : > { %1518 = vst [vmem:[%s2964_s26 + $0xd0] sm:$0xff] %v1486_v29 }
 0x238   : > { %1519 = vst [vmem:[%s2964_s26 + $0xd8] sm:$0xff] %v1487_v32 }
 0x239   : > { %1520 = vst [vmem:[%s2964_s26 + $0xe0] sm:$0xff] %v1488_v35 }
 0x23a   : > { %1521 = vst [vmem:[%s2964_s26 + $0xe8] sm:$0xff] %v1489_v3 }
 0x23b   : > { %1522 = vst [vmem:[%s2964_s26 + $0xf0] sm:$0xff] %v1490_v36 }
 0x23c   : > { %1523 = vst [vmem:[%s2964_s26 + $0xf8] sm:$0xff] %v1491_v38 }
 0x23d PF: > { %s3277_s18 = sld [smem:[#allocation20_spill]]  ;;  %s1538_s9 = sshll.u32 %s2964_s26, 4  ;;  %s1539_s9 = int_to_ptr.vmem [resolvable:$true] %s1538_s9 }
 0x23e   : > { %s3279_s29 = sld [smem:[#allocation29_spill]]  ;;  %s1525_s5 = scalar_lea.sflag [#allocation5], %s303_s6 }
 0x243   : > { %s2145_s15 = sshll.u32 %s3277_s18, 8 }
 0x244   : > { %s1537_s11 = scalar_lea.hbm %s3279_s29, %s2145_s15  ;;  %s2407_s22 = scalar_lea.hbm %s3279_s29, 512 }
 0x245   : > { %s1540_s21 = sshll.u32 %s1537_s11, 4  ;;  %s1541_s21 = int_to_ptr.hbm [resolvable:$true] %s1540_s21 }
 0x246   : > { %s2401_s10 = sshra.s32 %s1541_s21, 4  ;;  %s2402_s10 = int_to_ptr.hbm [resolvable:$true] %s2401_s10 }
 0x247   : > { %s2403_s2 = scalar_lea.hbm %s2402_s10, 256  ;;  %p2408_p4 = scmp.lt.s32.totalorder %s2402_s10, %s3279_s29 }
 0x248   : > { %p2404_p11 = scmp.ne.s32.totalorder %s2402_s10, %s2403_s2  ;;  %p2409_p2 = scmp.lt.s32.totalorder %s2407_s22, %s2403_s2 }
 0x24a   : > { %p2405_p0 = pnand %p2404_p11, %p2711_p7  ;;  %p2410_p3 = por %p2409_p2, %p2408_p4 }
 0x24c   : > { %p2406_p1 = pneg %p2405_p0 }
 0x24e   : > { %p2411_p6 = pnand %p2410_p3, %p2406_p1 }
 0x250   : > { %2414 = shalt.err (!%p2411_p6)
}
 0x251   : > { %s2553_s6 = smov 128   ;;  %s2554_s26 = smov 8  }
 0x252   : > { %2190 = dma.vmem_to_hbm [thread:$0]  (%p2711_p7), %s1539_s9, 4096, %s1541_s21, %s1525_s5, %s2553_s6, %s2553_s6, %s2554_s26  }
 0x253 PF: > { %s3280_s4 = sld [smem:[#allocation17_spill]]  ;;  %p2202_p8 = scmp.ge.s32.totalorder %s2541_s25, 2 }
 0x255   : > { %p2197_p12 = pnand %p2202_p8, %p2716_p10 }
 0x257   : > { %p2198_p13 = pneg %p2197_p12 }
 0x259   : > { %s1555_s18 = sand.u32 1, %s3280_s4  }
 0x25a   : > { %s1556_s15 = scalar_lea.sflag [#allocation5], %s1555_s18 }
 0x25b   : > { %2484 = dma.done.wait (%p2198_p13), %s1556_s15, 4096  }
 0x25c   : > { %2486 = vsyncadd (%p2198_p13), %s1556_s15, 4294963200  ;;  %s22_s25 = sadd.s32 1, %s2541_s25   ;;  %s3283_s14 = sld [smem:[#allocation18_spill]] }
 0x25d   : > { %p3188_p5 = scmp.ge.s32.totalorder %s22_s25, 8   ;;  %s3284_s30 = sld [smem:[#allocation25_spill]] }
 0x25e   : > { %s3285_s11 = sld [smem:[#allocation23_spill]]  ;;  %s3290_s12 = smov %s2493_s13 }
 0x25f   : > { %s3286_s9 = sld [smem:[#allocation24_spill]]  ;;  %s3293_s15 = smov %s2505_s16 }
 0x260   : > { %s3287_s5 = sld [smem:[#allocation21_spill]]  ;;  %s3294_s16 = smov %s2509_s17 }
 0x261   : > { %s3288_s10 = sld [smem:[#allocation22_spill]]  ;;  %s3296_s18 = smov %s2517_s19 }
 0x262   : > { %s3291_s13 = smov %s3283_s14  ;;  %s3297_s19 = smov %s2521_s20 }
 0x263   : > { %s3292_s14 = smov %s3284_s30  ;;  %s3299_s21 = smov %s2533_s23 }
 0x264   : > { %s3295_s17 = smov %s3285_s11  ;;  %s3300_s22 = smov %s2537_s24 }
 0x265   : > { %s3298_s20 = smov %s3286_s9  ;;  %21 = sbr.rel (!%p3188_p5) target bundleno = 15 (0xf), region = 116 }
 0x266   : > { %s3301_s23 = smov %s3287_s5 }
 0x267   : > { %s3302_s24 = smov %s3288_s10 }
 0x26a   :  { %1562 = vsyncpa [#allocation4], 1 }
 0x26b   :  { %1564 = vsyncpa [#allocation4 + $0x1], 1 }
 0x26c   :  { %1565 = vsyncpa [#allocation7], 1 }
 0x26d   :  { %1567 = vsyncpa [#allocation7 + $0x1], 1 }
 0x26e   :  { %1568 = vsyncpa [#allocation5], 1 }
 0x26f   :  { %1570 = vsyncpa [#allocation5 + $0x1], 1 }

</bundles_post_ra>
